<compile_context>
chip_gen: v6e
topology: v6e:2x2x1
jax: 0.10.0
libtpu: 0.0.40
codegen_flags: <defaults>
</compile_context>

<pallas_src>
import functools

import jax
import jax.numpy as jnp
from jax import lax
from jax.experimental import pallas as pl
from jax.experimental.pallas import tpu as pltpu


def _fused_kernel(x_ref, gate_ref, w_ref, gamma_ref, beta_ref, o_ref, *, eps):
    # x_ref:     [Cin, P]    spatially-flattened input (native NCHW order, N=1)
    # gate_ref:  [1, Cin]    SE gate logits (pre-sigmoid)
    # w_ref:     [Cout, Cin] 1x1 conv weight (native layout, no transpose)
    # gamma_ref: [Cout, 1]   BN scale
    # beta_ref:  [Cout, 1]   BN shift
    # o_ref:     [Cout, P]
    gate = jax.nn.sigmoid(gate_ref[...])                       # [1, Cin]
    # Fold the sigmoid gate into the (smaller) weight operand instead of
    # building a gated copy of X:  (W * g) @ X == W @ (X * g^T).
    w_g = w_ref[...] * gate                                    # [Cout, Cin]
    y = jnp.dot(w_g, x_ref[...],
                preferred_element_type=jnp.float32)            # [Cout, P]

    # Training-mode BatchNorm with biased batch statistics over the P
    # positions, computed in a single pass (sum / sum-of-squares).
    p = y.shape[1]
    inv_p = 1.0 / float(p)
    s = jnp.sum(y, axis=1, keepdims=True)                      # [Cout, 1]
    ss = jnp.sum(y * y, axis=1, keepdims=True)                 # [Cout, 1]
    mean = s * inv_p
    var = ss * inv_p - mean * mean
    inv_std = lax.rsqrt(var + eps)                             # [Cout, 1]
    o_ref[...] = (y - mean) * (inv_std * gamma_ref[...]) + beta_ref[...]


def fused_forward(x286, x282, conv_w, bn_gamma, bn_beta, *, eps=1e-5):
    """x286: [1, Cin, 1, 1], x282: [1, Cin, H, W], conv_w: [Cout, Cin, 1, 1]."""
    N, Cin, H, W = x282.shape
    assert N == 1, "kernel is specialized to the module's batch size of 1"
    Cout = conv_w.shape[0]
    P = N * H * W

    # All reshapes below preserve memory order (no transposes, no HBM round
    # trips beyond the pallas_call itself).
    x_cp = x282.reshape(Cin, P).astype(jnp.float32)            # [Cin, P]
    gate = x286.reshape(1, Cin).astype(jnp.float32)            # [1, Cin]
    w = conv_w.reshape(Cout, Cin).astype(jnp.float32)          # [Cout, Cin]
    gamma = bn_gamma.reshape(Cout, 1).astype(jnp.float32)
    beta = bn_beta.reshape(Cout, 1).astype(jnp.float32)

    bytes_accessed = 4 * (Cin * P + Cin + Cout * Cin + 2 * Cout + Cout * P)
    out_cp = pl.pallas_call(
        functools.partial(_fused_kernel, eps=eps),
        out_shape=jax.ShapeDtypeStruct((Cout, P), jnp.float32),
        in_specs=[
            pl.BlockSpec(memory_space=pltpu.MemorySpace.VMEM),
            pl.BlockSpec(memory_space=pltpu.MemorySpace.VMEM),
            pl.BlockSpec(memory_space=pltpu.MemorySpace.VMEM),
            pl.BlockSpec(memory_space=pltpu.MemorySpace.VMEM),
            pl.BlockSpec(memory_space=pltpu.MemorySpace.VMEM),
        ],
        out_specs=pl.BlockSpec(memory_space=pltpu.MemorySpace.VMEM),
        cost_estimate=pl.CostEstimate(
            flops=2 * Cout * Cin * P,
            transcendentals=Cin + Cout,
            bytes_accessed=bytes_accessed,
        ),
    )(x_cp, gate, w, gamma, beta)

    # [Cout, P] -> [1, Cout, H, W]  (pure reshape for N == 1)
    return out_cp.reshape(N, Cout, H, W)


def reference_forward(x286, x282, conv_w, bn_gamma, bn_beta, *, eps=1e-5):
    """Pure-JAX reference with identical semantics (for sanity checking)."""
    gate = jax.nn.sigmoid(x286)
    xg = x282 * gate
    y = jnp.einsum("nchw,oc->nohw", xg, conv_w.reshape(conv_w.shape[0], -1))
    mean = jnp.mean(y, axis=(0, 2, 3), keepdims=True)
    var = jnp.mean((y - mean) ** 2, axis=(0, 2, 3), keepdims=True)
    yn = (y - mean) * lax.rsqrt(var + eps)
    return yn * bn_gamma.reshape(1, -1, 1, 1) + bn_beta.reshape(1, -1, 1, 1)


if __name__ == "__main__":
    key = jax.random.PRNGKey(0)
    k1, k2, k3 = jax.random.split(key, 3)

    N, Cin, H, W, Cout = 1, 960, 14, 14, 160

    x282 = jax.random.normal(k1, (N, Cin, H, W), dtype=jnp.float32)
    x286 = jax.random.normal(k2, (N, Cin, 1, 1), dtype=jnp.float32)

    # Deterministic parameter init (synthetic — no checkpoint load).
    conv_w = jax.random.normal(k3, (Cout, Cin, 1, 1), dtype=jnp.float32) * 0.02
    bn_gamma = jnp.ones((Cout,), dtype=jnp.float32)   # PyTorch BN default init
    bn_beta = jnp.zeros((Cout,), dtype=jnp.float32)

    # TODO(synk): BN running_mean/running_var buffer updates (momentum=0.1)
    # are module side effects not returned by forward, so they are not emitted.

    out = fused_forward(x286, x282, conv_w, bn_gamma, bn_beta)
    out = jax.block_until_ready(out)

    ref = reference_forward(x286, x282, conv_w, bn_gamma, bn_beta)
    assert out.shape == (N, Cout, H, W), out.shape
    assert jnp.allclose(out, ref, atol=1e-4, rtol=1e-4), float(
        jnp.max(jnp.abs(out - ref)))

    print("KERNEL_OK")
</pallas_src>

<mosaic_0001>
module attributes {stable_mosaic.version = 11 : i64} {
  func.func @_fused_kernel(%arg0: memref<960x196xf32, #tpu.memory_space<vmem>>, %arg1: memref<1x960xf32, #tpu.memory_space<vmem>>, %arg2: memref<160x960xf32, #tpu.memory_space<vmem>>, %arg3: memref<160x1xf32, #tpu.memory_space<vmem>>, %arg4: memref<160x1xf32, #tpu.memory_space<vmem>>, %arg5: memref<160x196xf32, #tpu.memory_space<vmem>>) attributes {dimension_semantics = [], scalar_prefetch = 0 : i64, scratch_operands = 0 : i64, tpu.core_type = #tpu.core_type<tc>} {
    %c0 = arith.constant 0 : index
    %c0_0 = arith.constant 0 : index
    %0 = vector.load %arg1[%c0, %c0_0] : memref<1x960xf32, #tpu.memory_space<vmem>>, vector<1x960xf32>
    %1 = arith.negf %0 : vector<1x960xf32>
    %2 = math.exp %1 : vector<1x960xf32>
    %cst = arith.constant 1.000000e+00 : f32
    %3 = vector.broadcast %cst : f32 to vector<1x960xf32>
    %4 = arith.addf %3, %2 : vector<1x960xf32>
    %5 = arith.divf %3, %4 : vector<1x960xf32>
    %c0_1 = arith.constant 0 : index
    %c0_2 = arith.constant 0 : index
    %6 = vector.load %arg2[%c0_1, %c0_2] : memref<160x960xf32, #tpu.memory_space<vmem>>, vector<160x960xf32>
    %7 = vector.broadcast %5 : vector<1x960xf32> to vector<160x960xf32>
    %8 = arith.mulf %6, %7 : vector<160x960xf32>
    %c0_3 = arith.constant 0 : index
    %c0_4 = arith.constant 0 : index
    %9 = vector.load %arg0[%c0_3, %c0_4] : memref<960x196xf32, #tpu.memory_space<vmem>>, vector<960x196xf32>
    %cst_5 = arith.constant dense<0.000000e+00> : vector<160x196xf32>
    %10 = tpu.matmul %8, %9, %cst_5 {dimension_numbers = #tpu.dot_dimension_numbers<[1], [0], [0], [1], [0, 0, 1, 1], [], []>} : vector<160x960xf32>, vector<960x196xf32>, vector<160x196xf32> -> vector<160x196xf32>
    %cst_6 = arith.constant dense<0.000000e+00> : vector<160xf32>
    %11 = vector.multi_reduction <add>, %10, %cst_6 [1] : vector<160x196xf32> to vector<160xf32>
    %12 = vector.shape_cast %11 : vector<160xf32> to vector<160x1xf32>
    %13 = arith.mulf %10, %10 : vector<160x196xf32>
    %cst_7 = arith.constant dense<0.000000e+00> : vector<160xf32>
    %14 = vector.multi_reduction <add>, %13, %cst_7 [1] : vector<160x196xf32> to vector<160xf32>
    %15 = vector.shape_cast %14 : vector<160xf32> to vector<160x1xf32>
    %cst_8 = arith.constant 0.00510204071 : f32
    %16 = vector.broadcast %cst_8 : f32 to vector<160x1xf32>
    %17 = arith.mulf %12, %16 : vector<160x1xf32>
    %cst_9 = arith.constant 0.00510204071 : f32
    %18 = vector.broadcast %cst_9 : f32 to vector<160x1xf32>
    %19 = arith.mulf %15, %18 : vector<160x1xf32>
    %20 = arith.mulf %17, %17 : vector<160x1xf32>
    %21 = arith.subf %19, %20 : vector<160x1xf32>
    %cst_10 = arith.constant 9.99999974E-6 : f32
    %22 = vector.broadcast %cst_10 : f32 to vector<160x1xf32>
    %23 = arith.addf %21, %22 : vector<160x1xf32>
    %24 = math.rsqrt %23 : vector<160x1xf32>
    %25 = vector.broadcast %17 : vector<160x1xf32> to vector<160x196xf32>
    %26 = arith.subf %10, %25 : vector<160x196xf32>
    %c0_11 = arith.constant 0 : index
    %c0_12 = arith.constant 0 : index
    %27 = vector.load %arg3[%c0_11, %c0_12] : memref<160x1xf32, #tpu.memory_space<vmem>>, vector<160x1xf32>
    %28 = arith.mulf %24, %27 : vector<160x1xf32>
    %29 = vector.broadcast %28 : vector<160x1xf32> to vector<160x196xf32>
    %30 = arith.mulf %26, %29 : vector<160x196xf32>
    %c0_13 = arith.constant 0 : index
    %c0_14 = arith.constant 0 : index
    %31 = vector.load %arg4[%c0_13, %c0_14] : memref<160x1xf32, #tpu.memory_space<vmem>>, vector<160x1xf32>
    %32 = vector.broadcast %31 : vector<160x1xf32> to vector<160x196xf32>
    %33 = arith.addf %30, %32 : vector<160x196xf32>
    %c0_15 = arith.constant 0 : index
    %c0_16 = arith.constant 0 : index
    %34 = vector.load %arg5[%c0_15, %c0_16] : memref<160x196xf32, #tpu.memory_space<vmem>>, vector<160x196xf32>
    tpu.vector_store %arg5[%c0_15, %c0_16], %33 {strides = array<i32>} : memref<160x196xf32, #tpu.memory_space<vmem>>, vector<160x196xf32>,
    return
  }
}

</mosaic_0001>

<bundles_post_ra>
// kernel: tpu_custom_call.1
= control target key start
LH: loop header
LB: loop body
LE: loop exit
PB: predicated region body
PF: predicated region fallthrough
CT: control target
= control target key end

     0   :  { %s4436_s0 = inlined_call_operand.vmem [shape: f32[960,196], index: 0, kind: input, shape index: {}]   ;;  %s4437_s1 = inlined_call_operand.vmem [shape: f32[1,960], index: 1, kind: input, shape index: {}]   ;;  %s4438_s2 = inlined_call_operand.vmem [shape: f32[160,960], index: 2, kind: input, shape index: {}]   ;;  %s4439_s3 = inlined_call_operand.vmem [shape: f32[160,1], index: 3, kind: input, shape index: {}]   ;;  %s4440_s4 = inlined_call_operand.vmem [shape: f32[160,1], index: 4, kind: input, shape index: {}]   ;;  %s4441_s5 = inlined_call_operand.hbm [shape: f32[160,196], index: 5, kind: output, shape index: {}]  }
   0x1   :  { %v420_v0 = vld [vmem:[%s4436_s0 + $0xf8] sm:$0xff]  ;;  %v419_v2 = vld [vmem:[%s4436_s0 + $0xf0] sm:$0xff]  ;;  %v418_v4 = vld [vmem:[%s4436_s0 + $0xe8] sm:$0xff] }
   0x2   :  { %v484_v1 = vld [vmem:[%s4436_s0 + $0x2f8] sm:$0xff]  ;;  %690 = vmatprep.subr.mxu0 %v420_v0  ;;  %v483_v3 = vld [vmem:[%s4436_s0 + $0x2f0] sm:$0xff]  ;;  %v482_v5 = vld [vmem:[%s4436_s0 + $0x2e8] sm:$0xff] }
   0x3   :  { %875 = vmatprep.subr.mxu1 %v484_v1  ;;  %691 = vmatpush1.msra.mxu0 %v419_v2  ;;  %v417_v6 = vld [vmem:[%s4436_s0 + $0xe0] sm:$0xff]  ;;  %v416_v8 = vld [vmem:[%s4436_s0 + $0xd8] sm:$0xff]  ;;  %v415_v10 = vld [vmem:[%s4436_s0 + $0xd0] sm:$0xff] }
   0x4   :  { %876 = vmatpush1.msra.mxu1 %v483_v3  ;;  %v481_v7 = vld [vmem:[%s4436_s0 + $0x2e0] sm:$0xff]  ;;  %692 = vmatprep.subr.mxu0 %v418_v4  ;;  %v480_v9 = vld [vmem:[%s4436_s0 + $0x2d8] sm:$0xff]  ;;  %v479_v11 = vld [vmem:[%s4436_s0 + $0x2d0] sm:$0xff] }
   0x5   :  { %877 = vmatprep.subr.mxu1 %v482_v5  ;;  %693 = vmatpush1.msra.mxu0 %v417_v6  ;;  %v414_v12 = vld [vmem:[%s4436_s0 + $0xc8] sm:$0xff]  ;;  %v413_v14 = vld [vmem:[%s4436_s0 + $0xc0] sm:$0xff]  ;;  %v412_v16 = vld [vmem:[%s4436_s0 + $0xb8] sm:$0xff] }
   0x6   :  { %878 = vmatpush1.msra.mxu1 %v481_v7  ;;  %v478_v13 = vld [vmem:[%s4436_s0 + $0x2c8] sm:$0xff]  ;;  %694 = vmatprep.subr.mxu0 %v416_v8  ;;  %v477_v15 = vld [vmem:[%s4436_s0 + $0x2c0] sm:$0xff]  ;;  %v476_v17 = vld [vmem:[%s4436_s0 + $0x2b8] sm:$0xff] }
   0x7   :  { %879 = vmatprep.subr.mxu1 %v480_v9  ;;  %695 = vmatpush1.msra.mxu0 %v415_v10  ;;  %v411_v18 = vld [vmem:[%s4436_s0 + $0xb0] sm:$0xff]  ;;  %v410_v20 = vld [vmem:[%s4436_s0 + $0xa8] sm:$0xff]  ;;  %v409_v22 = vld [vmem:[%s4436_s0 + $0xa0] sm:$0xff] }
   0x8   :  { %880 = vmatpush1.msra.mxu1 %v479_v11  ;;  %696 = vmatprep.subr.mxu0 %v414_v12  ;;  %v475_v19 = vld [vmem:[%s4436_s0 + $0x2b0] sm:$0xff]  ;;  %v474_v21 = vld [vmem:[%s4436_s0 + $0x2a8] sm:$0xff]  ;;  %v473_v23 = vld [vmem:[%s4436_s0 + $0x2a0] sm:$0xff] }
   0x9   :  { %881 = vmatprep.subr.mxu1 %v478_v13  ;;  %697 = vmatpush1.msra.mxu0 %v413_v14  ;;  %v408_v24 = vld [vmem:[%s4436_s0 + $0x98] sm:$0xff]  ;;  %v407_v26 = vld [vmem:[%s4436_s0 + $0x90] sm:$0xff]  ;;  %v406_v28 = vld [vmem:[%s4436_s0 + $0x88] sm:$0xff] }
   0xa   :  { %882 = vmatpush1.msra.mxu1 %v477_v15  ;;  %698 = vmatprep.subr.mxu0 %v412_v16  ;;  %v472_v25 = vld [vmem:[%s4436_s0 + $0x298] sm:$0xff]  ;;  %v471_v27 = vld [vmem:[%s4436_s0 + $0x290] sm:$0xff]  ;;  %v470_v29 = vld [vmem:[%s4436_s0 + $0x288] sm:$0xff] }
   0xb   :  { %883 = vmatprep.subr.mxu1 %v476_v17  ;;  %699 = vmatpush1.msra.mxu0 %v411_v18  ;;  %v405_v30 = vld [vmem:[%s4436_s0 + $0x80] sm:$0xff]  ;;  %v404_v32 = vld [vmem:[%s4436_s0 + $0x78] sm:$0xff]  ;;  %v403_v34 = vld [vmem:[%s4436_s0 + $0x70] sm:$0xff] }
   0xc   :  { %884 = vmatpush1.msra.mxu1 %v475_v19  ;;  %700 = vmatprep.subr.mxu0 %v410_v20  ;;  %v469_v31 = vld [vmem:[%s4436_s0 + $0x280] sm:$0xff]  ;;  %v468_v33 = vld [vmem:[%s4436_s0 + $0x278] sm:$0xff]  ;;  %v467_v35 = vld [vmem:[%s4436_s0 + $0x270] sm:$0xff] }
   0xd   :  { %885 = vmatprep.subr.mxu1 %v474_v21  ;;  %701 = vmatpush1.msra.mxu0 %v409_v22  ;;  %v402_v36 = vld [vmem:[%s4436_s0 + $0x68] sm:$0xff]  ;;  %v401_v38 = vld [vmem:[%s4436_s0 + $0x60] sm:$0xff]  ;;  %v400_v40 = vld [vmem:[%s4436_s0 + $0x58] sm:$0xff] }
   0xe   :  { %886 = vmatpush1.msra.mxu1 %v473_v23  ;;  %702 = vmatprep.subr.mxu0 %v408_v24  ;;  %v466_v37 = vld [vmem:[%s4436_s0 + $0x268] sm:$0xff]  ;;  %v465_v39 = vld [vmem:[%s4436_s0 + $0x260] sm:$0xff]  ;;  %v464_v41 = vld [vmem:[%s4436_s0 + $0x258] sm:$0xff] }
   0xf   :  { %887 = vmatprep.subr.mxu1 %v472_v25  ;;  %703 = vmatpush1.msra.mxu0 %v407_v26  ;;  %v399_v42 = vld [vmem:[%s4436_s0 + $0x50] sm:$0xff]  ;;  %v398_v44 = vld [vmem:[%s4436_s0 + $0x48] sm:$0xff]  ;;  %v397_v46 = vld [vmem:[%s4436_s0 + $0x40] sm:$0xff] }
  0x10   :  { %888 = vmatpush1.msra.mxu1 %v471_v27  ;;  %704 = vmatprep.subr.mxu0 %v406_v28  ;;  %v463_v43 = vld [vmem:[%s4436_s0 + $0x250] sm:$0xff]  ;;  %v462_v45 = vld [vmem:[%s4436_s0 + $0x248] sm:$0xff]  ;;  %v461_v47 = vld [vmem:[%s4436_s0 + $0x240] sm:$0xff] }
  0x11   :  { %889 = vmatprep.subr.mxu1 %v470_v29  ;;  %705 = vmatpush1.msra.mxu0 %v405_v30  ;;  %v396_v48 = vld [vmem:[%s4436_s0 + $0x38] sm:$0xff]  ;;  %v395_v50 = vld [vmem:[%s4436_s0 + $0x30] sm:$0xff]  ;;  %v394_v52 = vld [vmem:[%s4436_s0 + $0x28] sm:$0xff] }
  0x12   :  { %890 = vmatpush1.msra.mxu1 %v469_v31  ;;  %706 = vmatprep.subr.mxu0 %v404_v32  ;;  %v460_v49 = vld [vmem:[%s4436_s0 + $0x238] sm:$0xff]  ;;  %v459_v51 = vld [vmem:[%s4436_s0 + $0x230] sm:$0xff]  ;;  %v458_v53 = vld [vmem:[%s4436_s0 + $0x228] sm:$0xff] }
  0x13   :  { %891 = vmatprep.subr.mxu1 %v468_v33  ;;  %707 = vmatpush1.msra.mxu0 %v403_v34  ;;  %v393_v54 = vld [vmem:[%s4436_s0 + $0x20] sm:$0xff]  ;;  %v392_v56 = vld [vmem:[%s4436_s0 + $0x18] sm:$0xff]  ;;  %v391_v58 = vld [vmem:[%s4436_s0 + $0x10] sm:$0xff] }
  0x14   :  { %892 = vmatpush1.msra.mxu1 %v467_v35  ;;  %708 = vmatprep.subr.mxu0 %v402_v36  ;;  %v457_v55 = vld [vmem:[%s4436_s0 + $0x220] sm:$0xff]  ;;  %v456_v57 = vld [vmem:[%s4436_s0 + $0x218] sm:$0xff]  ;;  %v455_v59 = vld [vmem:[%s4436_s0 + $0x210] sm:$0xff] }
  0x15   :  { %893 = vmatprep.subr.mxu1 %v466_v37  ;;  %709 = vmatpush1.msra.mxu0 %v401_v38  ;;  %v390_v60 = vld [vmem:[%s4436_s0 + $0x8] sm:$0xff]  ;;  %v389_v62 = vld [vmem:[%s4436_s0] sm:$0xff]  ;;  %v452_v0 = vld [vmem:[%s4436_s0 + $0x1f8] sm:$0xff] }
  0x16   :  { %894 = vmatpush1.msra.mxu1 %v465_v39  ;;  %710 = vmatprep.subr.mxu0 %v400_v40  ;;  %v454_v61 = vld [vmem:[%s4436_s0 + $0x208] sm:$0xff]  ;;  %v453_v63 = vld [vmem:[%s4436_s0 + $0x200] sm:$0xff]  ;;  %v516_v1 = vld [vmem:[%s4436_s0 + $0x3f8] sm:$0xff] }
  0x17   :  { %895 = vmatprep.subr.mxu1 %v464_v41  ;;  %711 = vmatpush1.msra.mxu0 %v399_v42  ;;  %v451_v2 = vld [vmem:[%s4436_s0 + $0x1f0] sm:$0xff]  ;;  %v450_v4 = vld [vmem:[%s4436_s0 + $0x1e8] sm:$0xff]  ;;  %v449_v6 = vld [vmem:[%s4436_s0 + $0x1e0] sm:$0xff] }
  0x18   :  { %896 = vmatpush1.msra.mxu1 %v463_v43  ;;  %712 = vmatprep.subr.mxu0 %v398_v44  ;;  %v515_v3 = vld [vmem:[%s4436_s0 + $0x3f0] sm:$0xff]  ;;  %v514_v5 = vld [vmem:[%s4436_s0 + $0x3e8] sm:$0xff]  ;;  %v513_v7 = vld [vmem:[%s4436_s0 + $0x3e0] sm:$0xff] }
  0x19   :  { %897 = vmatprep.subr.mxu1 %v462_v45  ;;  %713 = vmatpush1.msra.mxu0 %v397_v46  ;;  %v448_v8 = vld [vmem:[%s4436_s0 + $0x1d8] sm:$0xff]  ;;  %v447_v10 = vld [vmem:[%s4436_s0 + $0x1d0] sm:$0xff]  ;;  %v446_v12 = vld [vmem:[%s4436_s0 + $0x1c8] sm:$0xff] }
  0x1a   :  { %898 = vmatpush1.msra.mxu1 %v461_v47  ;;  %714 = vmatprep.subr.mxu0 %v396_v48  ;;  %v512_v9 = vld [vmem:[%s4436_s0 + $0x3d8] sm:$0xff]  ;;  %v511_v11 = vld [vmem:[%s4436_s0 + $0x3d0] sm:$0xff]  ;;  %v510_v13 = vld [vmem:[%s4436_s0 + $0x3c8] sm:$0xff] }
  0x1b   :  { %899 = vmatprep.subr.mxu1 %v460_v49  ;;  %715 = vmatpush1.msra.mxu0 %v395_v50  ;;  %v445_v14 = vld [vmem:[%s4436_s0 + $0x1c0] sm:$0xff]  ;;  %v444_v16 = vld [vmem:[%s4436_s0 + $0x1b8] sm:$0xff]  ;;  %v443_v18 = vld [vmem:[%s4436_s0 + $0x1b0] sm:$0xff] }
  0x1c   :  { %900 = vmatpush1.msra.mxu1 %v459_v51  ;;  %716 = vmatprep.subr.mxu0 %v394_v52  ;;  %v509_v15 = vld [vmem:[%s4436_s0 + $0x3c0] sm:$0xff]  ;;  %v508_v17 = vld [vmem:[%s4436_s0 + $0x3b8] sm:$0xff]  ;;  %v507_v19 = vld [vmem:[%s4436_s0 + $0x3b0] sm:$0xff] }
  0x1d   :  { %901 = vmatprep.subr.mxu1 %v458_v53  ;;  %717 = vmatpush1.msra.mxu0 %v393_v54  ;;  %v442_v20 = vld [vmem:[%s4436_s0 + $0x1a8] sm:$0xff]  ;;  %v441_v22 = vld [vmem:[%s4436_s0 + $0x1a0] sm:$0xff]  ;;  %v440_v24 = vld [vmem:[%s4436_s0 + $0x198] sm:$0xff] }
  0x1e   :  { %902 = vmatpush1.msra.mxu1 %v457_v55  ;;  %718 = vmatprep.subr.mxu0 %v392_v56  ;;  %v506_v21 = vld [vmem:[%s4436_s0 + $0x3a8] sm:$0xff]  ;;  %v505_v23 = vld [vmem:[%s4436_s0 + $0x3a0] sm:$0xff]  ;;  %v504_v25 = vld [vmem:[%s4436_s0 + $0x398] sm:$0xff] }
  0x1f   :  { %903 = vmatprep.subr.mxu1 %v456_v57  ;;  %719 = vmatpush1.msra.mxu0 %v391_v58  ;;  %v21_v26 = vld [vmem:[%s4437_s1] sm:$0xff]  ;;  %v439_v27 = vld [vmem:[%s4436_s0 + $0x190] sm:$0xff]  ;;  %v438_v30 = vld [vmem:[%s4436_s0 + $0x188] sm:$0xff] }
  0x20   :  { %904 = vmatpush1.msra.mxu1 %v455_v59  ;;  %720 = vmatprep.subr.mxu0 %v390_v60  ;;  %v503_v28 = vld [vmem:[%s4436_s0 + $0x390] sm:$0xff]  ;;  %v2187_v29 = vmul.f32 -1.442695, %v21_v26  ;;  %v502_v31 = vld [vmem:[%s4436_s0 + $0x388] sm:$0xff]  ;;  %v437_v32 = vld [vmem:[%s4436_s0 + $0x180] sm:$0xff] }
  0x21   :  { %905 = vmatprep.subr.mxu1 %v454_v61  ;;  %721 = vmatpush1.msra.mxu0 %v389_v62  ;;  %v501_v33 = vld [vmem:[%s4436_s0 + $0x380] sm:$0xff]  ;;  %v436_v34 = vld [vmem:[%s4436_s0 + $0x178] sm:$0xff]  ;;  %v435_v36 = vld [vmem:[%s4436_s0 + $0x170] sm:$0xff] }
  0x22   :  { %906 = vmatpush1.msra.mxu1 %v453_v63  ;;  %722 = vmatprep.subr.mxu0 %v452_v0  ;;  %2214 = vpow2.f32 %v2187_v29  ;;  %v500_v35 = vld [vmem:[%s4436_s0 + $0x378] sm:$0xff]  ;;  %v499_v37 = vld [vmem:[%s4436_s0 + $0x370] sm:$0xff]  ;;  %v434_v38 = vld [vmem:[%s4436_s0 + $0x168] sm:$0xff] }
  0x23   :  { %907 = vmatprep.subr.mxu1 %v516_v1  ;;  %723 = vmatpush2.msra.mxu0 %v451_v2  ;;  %v498_v39 = vld [vmem:[%s4436_s0 + $0x368] sm:$0xff]  ;;  %v433_v40 = vld [vmem:[%s4436_s0 + $0x160] sm:$0xff]  ;;  %v432_v42 = vld [vmem:[%s4436_s0 + $0x158] sm:$0xff] }
  0x24   :  { %908 = vmatpush2.msra.mxu1 %v515_v3  ;;  %724 = vmatprep.subr.mxu0 %v450_v4  ;;  %v497_v41 = vld [vmem:[%s4436_s0 + $0x360] sm:$0xff]  ;;  %v496_v43 = vld [vmem:[%s4436_s0 + $0x358] sm:$0xff]  ;;  %v431_v44 = vld [vmem:[%s4436_s0 + $0x150] sm:$0xff] }
  0x25   :  { %909 = vmatprep.subr.mxu1 %v514_v5  ;;  %725 = vmatpush2.msra.mxu0 %v449_v6  ;;  %v495_v45 = vld [vmem:[%s4436_s0 + $0x350] sm:$0xff]  ;;  %v430_v46 = vld [vmem:[%s4436_s0 + $0x148] sm:$0xff]  ;;  %v429_v48 = vld [vmem:[%s4436_s0 + $0x140] sm:$0xff]  ;;  %v189_v6 = vlaneseq }
  0x26   :  { %910 = vmatpush2.msra.mxu1 %v513_v7  ;;  %726 = vmatprep.subr.mxu0 %v448_v8  ;;  %v494_v47 = vld [vmem:[%s4436_s0 + $0x348] sm:$0xff]  ;;  %v493_v49 = vld [vmem:[%s4436_s0 + $0x340] sm:$0xff]  ;;  %v428_v50 = vld [vmem:[%s4436_s0 + $0x138] sm:$0xff] }
  0x27   :  { %911 = vmatprep.subr.mxu1 %v512_v9  ;;  %727 = vmatpush2.msra.mxu0 %v447_v10  ;;  %v492_v51 = vld [vmem:[%s4436_s0 + $0x338] sm:$0xff]  ;;  %v427_v52 = vld [vmem:[%s4436_s0 + $0x130] sm:$0xff]  ;;  %v426_v54 = vld [vmem:[%s4436_s0 + $0x128] sm:$0xff]  ;;  %v190_v7 = vshrl.u32 %v189_v6, 7 }
  0x28   :  { %912 = vmatpush2.msra.mxu1 %v511_v11  ;;  %728 = vmatprep.subr.mxu0 %v446_v12  ;;  %v491_v53 = vld [vmem:[%s4436_s0 + $0x330] sm:$0xff]  ;;  %v490_v55 = vld [vmem:[%s4436_s0 + $0x328] sm:$0xff]  ;;  %v425_v56 = vld [vmem:[%s4436_s0 + $0x120] sm:$0xff] }
  0x29   :  { %913 = vmatprep.subr.mxu1 %v510_v13  ;;  %729 = vmatpush2.msra.mxu0 %v445_v14  ;;  %v489_v57 = vld [vmem:[%s4436_s0 + $0x320] sm:$0xff]  ;;  %v424_v59 = vld [vmem:[%s4436_s0 + $0x118] sm:$0xff]  ;;  %v423_v61 = vld [vmem:[%s4436_s0 + $0x110] sm:$0xff]  ;;  %v195_v8 = vsub.s32 1, %v190_v7  ;;  %v203_v9 = vsub.s32 3, %v190_v7  ;;  %v191_v10 = vsub.s32 0, %v190_v7 }
  0x2a   :  { %914 = vmatpush2.msra.mxu1 %v509_v15  ;;  %730 = vmatprep.subr.mxu0 %v444_v16  ;;  %v488_v60 = vld [vmem:[%s4436_s0 + $0x318] sm:$0xff]  ;;  %v487_v62 = vld [vmem:[%s4436_s0 + $0x310] sm:$0xff]  ;;  %v422_v0 = vld [vmem:[%s4436_s0 + $0x108] sm:$0xff]  ;;  %v199_v11 = vsub.s32 2, %v190_v7  ;;  %v211_v12 = vsub.s32 5, %v190_v7  ;;  %v207_v13 = vsub.s32 4, %v190_v7 }
  0x2b   :  { %915 = vmatprep.subr.mxu1 %v508_v17  ;;  %731 = vmatpush2.msra.mxu0 %v443_v18  ;;  %v486_v1 = vld [vmem:[%s4436_s0 + $0x308] sm:$0xff]  ;;  %v421_v2 = vld [vmem:[%s4436_s0 + $0x100] sm:$0xff]  ;;  %v548_v4 = vld [vmem:[%s4436_s0 + $0x4f8] sm:$0xff]  ;;  %v219_v14 = vsub.s32 7, %v190_v7  ;;  %v215_v15 = vsub.s32 6, %v190_v7 }
  0x2c   :  { %916 = vmatpush2.msra.mxu1 %v507_v19  ;;  %732 = vmatprep.subr.mxu0 %v442_v20  ;;  %v485_v3 = vld [vmem:[%s4436_s0 + $0x300] sm:$0xff]  ;;  %v612_v5 = vld [vmem:[%s4436_s0 + $0x6f8] sm:$0xff]  ;;  %v29_v16 = vld [vmem:[%s4438_s2 + $0x8] sm:$0xff] }
  0x2d   :  { %917 = vmatprep.subr.mxu1 %v506_v21  ;;  %733 = vmatpush2.msra.mxu0 %v441_v22  ;;  %v31_v18 = vld [vmem:[%s4438_s2 + $0x18] sm:$0xff]  ;;  %v28_v19 = vld [vmem:[%s4438_s2] sm:$0xff]  ;;  %v30_v20 = vld [vmem:[%s4438_s2 + $0x10] sm:$0xff] }
  0x2e   :  { %918 = vmatpush2.msra.mxu1 %v505_v23  ;;  %734 = vmatprep.subr.mxu0 %v440_v24  ;;  %v39_v26 = vld [vmem:[%s4438_s2 + $0x58] sm:$0xff]  ;;  %v61_v7 = vld [vmem:[%s4438_s2 + $0x108] sm:$0xff] }
  0x2f   :  { %919 = vmatprep.subr.mxu1 %v504_v25  ;;  %735 = vmatpush2.msra.mxu0 %v439_v27  ;;  %v2215_v58 = vpop.eup %2214  ;;  %v37_v25 = vld [vmem:[%s4438_s2 + $0x48] sm:$0xff] }
  0x30   :  { %920 = vmatpush2.msra.mxu1 %v503_v28  ;;  %736 = vmatprep.subr.mxu0 %v438_v30  ;;  %v25_v63 = vadd.f32 1.0, %v2215_v58  ;;  %v542_v58 = vld [vmem:[%s4436_s0 + $0x4c8] sm:$0xff] }
  0x31   :  { %921 = vmatprep.subr.mxu1 %v502_v31  ;;  %737 = vmatpush2.msra.mxu0 %v437_v32 }
  0x32   :  { %922 = vmatpush2.msra.mxu1 %v501_v33  ;;  %738 = vmatprep.subr.mxu0 %v436_v34  ;;  %2216 = vrcp.f32 %v25_v63  ;;  %v541_v63 = vld [vmem:[%s4436_s0 + $0x4c0] sm:$0xff] }
  0x33   :  { %923 = vmatprep.subr.mxu1 %v500_v35  ;;  %739 = vmatpush2.msra.mxu0 %v435_v36  ;;  %v36_v35 = vld [vmem:[%s4438_s2 + $0x40] sm:$0xff]  ;;  %v38_v36 = vld [vmem:[%s4438_s2 + $0x50] sm:$0xff] }
  0x34   :  { %924 = vmatpush2.msra.mxu1 %v499_v37  ;;  %740 = vmatprep.subr.mxu0 %v434_v38  ;;  %v547_v37 = vld [vmem:[%s4436_s0 + $0x4f0] sm:$0xff] }
  0x35   :  { %925 = vmatprep.subr.mxu1 %v498_v39  ;;  %741 = vmatpush2.msra.mxu0 %v433_v40  ;;  %v546_v40 = vld [vmem:[%s4436_s0 + $0x4e8] sm:$0xff] }
  0x36   :  { %926 = vmatpush2.msra.mxu1 %v497_v41  ;;  %742 = vmatprep.subr.mxu0 %v432_v42  ;;  %v45_v41 = vld [vmem:[%s4438_s2 + $0x88] sm:$0xff]  ;;  %v611_v42 = vld [vmem:[%s4436_s0 + $0x6f0] sm:$0xff] }
  0x37   :  { %927 = vmatprep.subr.mxu1 %v496_v43  ;;  %743 = vmatpush2.msra.mxu0 %v431_v44 }
  0x38   :  { %928 = vmatpush2.msra.mxu1 %v495_v45  ;;  %744 = vmatprep.subr.mxu0 %v430_v46  ;;  %v545_v45 = vld [vmem:[%s4436_s0 + $0x4e0] sm:$0xff]  ;;  %v47_v46 = vld [vmem:[%s4438_s2 + $0x98] sm:$0xff] }
  0x39   :  { %929 = vmatprep.subr.mxu1 %v494_v47  ;;  %745 = vmatpush2.msra.mxu0 %v429_v48  ;;  %v44_v47 = vld [vmem:[%s4438_s2 + $0x80] sm:$0xff]  ;;  %v46_v48 = vld [vmem:[%s4438_s2 + $0x90] sm:$0xff] }
  0x3a   :  { %930 = vmatpush2.msra.mxu1 %v493_v49  ;;  %746 = vmatprep.subr.mxu0 %v428_v50  ;;  %v544_v49 = vld [vmem:[%s4436_s0 + $0x4d8] sm:$0xff]  ;;  %v610_v50 = vld [vmem:[%s4436_s0 + $0x6e8] sm:$0xff] }
  0x3b   :  { %931 = vmatprep.subr.mxu1 %v492_v51  ;;  %747 = vmatpush2.msra.mxu0 %v427_v52  ;;  %v543_v52 = vld [vmem:[%s4436_s0 + $0x4d0] sm:$0xff] }
  0x3c   :  { %932 = vmatpush2.msra.mxu1 %v491_v53  ;;  %748 = vmatprep.subr.mxu0 %v426_v54  ;;  %v609_v54 = vld [vmem:[%s4436_s0 + $0x6e0] sm:$0xff] }
  0x3d   :  { %933 = vmatprep.subr.mxu1 %v490_v55  ;;  %749 = vmatpush2.msra.mxu0 %v425_v56 }
  0x3e   :  { %934 = vmatpush2.msra.mxu1 %v489_v57  ;;  %750 = vmatprep.subr.mxu0 %v424_v59  ;;  %v53_v57 = vld [vmem:[%s4438_s2 + $0xc8] sm:$0xff]  ;;  %v55_v59 = vld [vmem:[%s4438_s2 + $0xd8] sm:$0xff] }
  0x3f   :  { %935 = vmatprep.subr.mxu1 %v488_v60  ;;  %751 = vmatpush2.msra.mxu0 %v423_v61  ;;  %v2217_v17 = vpop.eup %2216  ;;  %v608_v60 = vld [vmem:[%s4436_s0 + $0x6d8] sm:$0xff]  ;;  %v52_v61 = vld [vmem:[%s4438_s2 + $0xc0] sm:$0xff] }
  0x40   :  { %936 = vmatpush2.msra.mxu1 %v487_v62  ;;  %752 = vmatprep.subr.mxu0 %v422_v0  ;;  %v2719_v21 = vrot.slane %v2217_v17, %v195_v8  ;;  %v2721_v22 = vrot.slane %v2217_v17, %v203_v9  ;;  %v2723_v23 = vrot.slane %v2217_v17, %v191_v10  ;;  %v54_v62 = vld [vmem:[%s4438_s2 + $0xd0] sm:$0xff]  ;;  %v63_v8 = vld [vmem:[%s4438_s2 + $0x118] sm:$0xff]  ;;  %v60_v9 = vld [vmem:[%s4438_s2 + $0x100] sm:$0xff] }
  0x41   :  { %937 = vmatprep.subr.mxu1 %v486_v1  ;;  %753 = vmatpush2.msra.mxu0 %v421_v2  ;;  %v2725_v24 = vrot.slane %v2217_v17, %v199_v11  ;;  %v2733_v27 = vrot.slane %v2217_v17, %v211_v12  ;;  %v2735_v28 = vrot.slane %v2217_v17, %v207_v13  ;;  %v607_v0 = vld [vmem:[%s4436_s0 + $0x6d0] sm:$0xff]  ;;  %v540_v2 = vld [vmem:[%s4436_s0 + $0x4b8] sm:$0xff]  ;;  %v606_v10 = vld [vmem:[%s4436_s0 + $0x6c8] sm:$0xff] }
  0x42   :  { %938 = vmatpush2.msra.mxu1 %v485_v3  ;;  %1060 = vmatprep.subr.mxu0 %v548_v4  ;;  %v2737_v29 = vrot.slane %v2217_v17, %v219_v14  ;;  %v2739_v30 = vrot.slane %v2217_v17, %v215_v15  ;;  %v230_v31 = vmul.f32 %v2719_v21, %v29_v16  ;;  %v539_v4 = vld [vmem:[%s4436_s0 + $0x4b0] sm:$0xff]  ;;  %v538_v11 = vld [vmem:[%s4436_s0 + $0x4a8] sm:$0xff]  ;;  %v605_v13 = vld [vmem:[%s4436_s0 + $0x6c0] sm:$0xff] }
  0x43   :  { %1245 = vmatprep.subr.mxu1 %v612_v5  ;;  %v232_v32 = vmul.f32 %v2721_v22, %v31_v18  ;;  %v229_v33 = vmul.f32 %v2723_v23, %v28_v19  ;;  %v231_v34 = vmul.f32 %v2725_v24, %v30_v20  ;;  %v238_v38 = vmul.f32 %v2719_v21, %v37_v25  ;;  %v62_v12 = vld [vmem:[%s4438_s2 + $0x110] sm:$0xff]  ;;  %v537_v14 = vld [vmem:[%s4436_s0 + $0x4a0] sm:$0xff]  ;;  %v69_v18 = vld [vmem:[%s4438_s2 + $0x148] sm:$0xff] }
  0x44   :  { %v240_v39 = vmul.f32 %v2721_v22, %v39_v26  ;;  %754 = vmatprep.mubr.f32.mxu0 %v230_v31  ;;  %v237_v43 = vmul.f32 %v2723_v23, %v36_v35  ;;  %v239_v44 = vmul.f32 %v2725_v24, %v38_v36  ;;  %v246_v51 = vmul.f32 %v2719_v21, %v45_v41  ;;  %v536_v19 = vld [vmem:[%s4436_s0 + $0x498] sm:$0xff]  ;;  %v535_v26 = vld [vmem:[%s4436_s0 + $0x490] sm:$0xff]  ;;  %v68_v31 = vld [vmem:[%s4438_s2 + $0x140] sm:$0xff] }
  0x45   :  { %939 = vmatprep.mubr.f32.mxu1 %v232_v32  ;;  %755 = vmatmul.mubr.f32.vlgmr.msra.gmra.mxu0 %v229_v33  ;;  %v248_v53 = vmul.f32 %v2721_v22, %v47_v46  ;;  %v245_v55 = vmul.f32 %v2723_v23, %v44_v47  ;;  %v247_v56 = vmul.f32 %v2725_v24, %v46_v48  ;;  %v71_v25 = vld [vmem:[%s4438_s2 + $0x158] sm:$0xff]  ;;  %v534_v33 = vld [vmem:[%s4436_s0 + $0x488] sm:$0xff]  ;;  %v70_v35 = vld [vmem:[%s4438_s2 + $0x150] sm:$0xff] }
  0x46   :  { %940 = vmatmul.mubr.f32.vlgmr.msra.gmra.mxu1 %v231_v34  ;;  %1061 = vmatpush1.msra.mxu0 %v547_v37  ;;  %v254_v1 = vmul.f32 %v2719_v21, %v53_v57  ;;  %v256_v3 = vmul.f32 %v2721_v22, %v55_v59  ;;  %v253_v5 = vmul.f32 %v2723_v23, %v52_v61  ;;  %v604_v32 = vld [vmem:[%s4436_s0 + $0x6b8] sm:$0xff]  ;;  %v603_v36 = vld [vmem:[%s4436_s0 + $0x6b0] sm:$0xff]  ;;  %v602_v41 = vld [vmem:[%s4436_s0 + $0x6a8] sm:$0xff] }
  0x47   :  { %760 = vmatprep.mubr.f32.mxu0 %v238_v38  ;;  %945 = vmatprep.mubr.f32.mxu1 %v240_v39  ;;  %v255_v6 = vmul.f32 %v2725_v24, %v54_v62  ;;  %v262_v15 = vmul.f32 %v2719_v21, %v61_v7  ;;  %v264_v16 = vmul.f32 %v2721_v22, %v63_v8  ;;  %v533_v38 = vld [vmem:[%s4436_s0 + $0x480] sm:$0xff]  ;;  %v531_v47 = vld [vmem:[%s4436_s0 + $0x470] sm:$0xff]  ;;  %v87_v57 = vld [vmem:[%s4438_s2 + $0x1d8] sm:$0xff] }
  0x48   :  { %1062 = vmatprep.subr.mxu0 %v546_v40  ;;  %1246 = vmatpush1.msra.mxu1 %v611_v42  ;;  %v261_v17 = vmul.f32 %v2723_v23, %v60_v9  ;;  %v263_v20 = vmul.f32 %v2725_v24, %v62_v12  ;;  %v270_v34 = vmul.f32 %v2719_v21, %v69_v18  ;;  %v77_v40 = vld [vmem:[%s4438_s2 + $0x188] sm:$0xff]  ;;  %v601_v46 = vld [vmem:[%s4436_s0 + $0x6a0] sm:$0xff]  ;;  %v528_v61 = vld [vmem:[%s4436_s0 + $0x458] sm:$0xff] }
  0x49   :  { %1063 = vmatpush1.msra.mxu0 %v545_v45  ;;  %1247 = vmatprep.subr.mxu1 %v610_v50  ;;  %v272_v37 = vmul.f32 %v2721_v22, %v71_v25  ;;  %v269_v39 = vmul.f32 %v2723_v23, %v68_v31  ;;  %v271_v42 = vmul.f32 %v2725_v24, %v70_v35  ;;  %v76_v45 = vld [vmem:[%s4438_s2 + $0x180] sm:$0xff]  ;;  %v600_v50 = vld [vmem:[%s4436_s0 + $0x698] sm:$0xff]  ;;  %v598_v62 = vld [vmem:[%s4436_s0 + $0x688] sm:$0xff] }
  0x4a   :  { %761 = vmatmul.mubr.f32.gmra.mxu0 %v237_v43  ;;  %946 = vmatmul.mubr.f32.gmra.mxu1 %v239_v44  ;;  %v79_v43 = vld [vmem:[%s4438_s2 + $0x198] sm:$0xff]  ;;  %v278_v48 = vmul.f32 %v2719_v21, %v77_v40  ;;  %v84_v59 = vld [vmem:[%s4438_s2 + $0x1c0] sm:$0xff]  ;;  %v595_v12 = vld [vmem:[%s4436_s0 + $0x670] sm:$0xff] }
  0x4b   :  { %1064 = vmatprep.subr.mxu0 %v544_v49  ;;  %766 = vmatprep.mubr.f32.mxu0 %v246_v51  ;;  %v532_v44 = vld [vmem:[%s4436_s0 + $0x478] sm:$0xff]  ;;  %v78_v49 = vld [vmem:[%s4438_s2 + $0x190] sm:$0xff]  ;;  %v280_v51 = vmul.f32 %v2721_v22, %v79_v43  ;;  %v92_v9 = vld [vmem:[%s4438_s2 + $0x200] sm:$0xff] }
  0x4c   :  { %1065 = vmatpush1.msra.mxu0 %v543_v52  ;;  %951 = vmatprep.mubr.f32.mxu1 %v248_v53  ;;  %v530_v52 = vld [vmem:[%s4436_s0 + $0x468] sm:$0xff]  ;;  %v277_v53 = vmul.f32 %v2723_v23, %v76_v45  ;;  %v95_v7 = vld [vmem:[%s4438_s2 + $0x218] sm:$0xff]  ;;  %v100_v25 = vld [vmem:[%s4438_s2 + $0x240] sm:$0xff] }
  0x4d   :  { %1248 = vmatpush1.msra.mxu1 %v609_v54  ;;  %1066 = vmatprep.subr.mxu0 %v542_v58  ;;  %v85_v54 = vld [vmem:[%s4438_s2 + $0x1c8] sm:$0xff]  ;;  %v529_v58 = vld [vmem:[%s4436_s0 + $0x460] sm:$0xff]  ;;  %v596_v8 = vld [vmem:[%s4436_s0 + $0x678] sm:$0xff] }
  0x4e   :  { %767 = vmatmul.mubr.f32.gmra.mxu0 %v245_v55  ;;  %952 = vmatmul.mubr.f32.gmra.mxu1 %v247_v56  ;;  %v599_v55 = vld [vmem:[%s4436_s0 + $0x690] sm:$0xff]  ;;  %v279_v56 = vmul.f32 %v2725_v24, %v78_v49  ;;  %v522_v31 = vld [vmem:[%s4436_s0 + $0x428] sm:$0xff]  ;;  %v108_v43 = vld [vmem:[%s4438_s2 + $0x280] sm:$0xff] }
  0x4f   :  { %1249 = vmatprep.subr.mxu1 %v608_v60  ;;  %1067 = vmatpush1.msra.mxu0 %v541_v63  ;;  %v86_v60 = vld [vmem:[%s4438_s2 + $0x1d0] sm:$0xff]  ;;  %v286_v63 = vmul.f32 %v2719_v21, %v85_v54  ;;  %v518_v45 = vld [vmem:[%s4436_s0 + $0x408] sm:$0xff] }
  0x50   :  { %1250 = vmatpush1.msra.mxu1 %v607_v0  ;;  %1068 = vmatprep.subr.mxu0 %v540_v2  ;;  %v527_v0 = vld [vmem:[%s4436_s0 + $0x450] sm:$0xff]  ;;  %v597_v2 = vld [vmem:[%s4436_s0 + $0x680] sm:$0xff] }
  0x51   :  { %772 = vmatprep.mubr.f32.mxu0 %v254_v1  ;;  %957 = vmatprep.mubr.f32.mxu1 %v256_v3  ;;  %v288_v1 = vmul.f32 %v2721_v22, %v87_v57  ;;  %v285_v3 = vmul.f32 %v2723_v23, %v84_v59  ;;  %v116_v57 = vld [vmem:[%s4438_s2 + $0x2c0] sm:$0xff]  ;;  %v579_v59 = vld [vmem:[%s4436_s0 + $0x5f0] sm:$0xff] }
  0x52   :  { %1069 = vmatpush1.msra.mxu0 %v539_v4  ;;  %958 = vmatmul.mubr.f32.gmra.mxu1 %v255_v6  ;;  %v287_v4 = vmul.f32 %v2725_v24, %v86_v60  ;;  %v526_v6 = vld [vmem:[%s4436_s0 + $0x448] sm:$0xff] }
  0x53   :  { %773 = vmatmul.mubr.f32.gmra.mxu0 %v253_v5  ;;  %1251 = vmatprep.subr.mxu1 %v606_v10  ;;  %v93_v5 = vld [vmem:[%s4438_s2 + $0x208] sm:$0xff]  ;;  %v94_v10 = vld [vmem:[%s4438_s2 + $0x210] sm:$0xff] }
  0x54   :  { %1070 = vmatprep.subr.mxu0 %v538_v11  ;;  %1252 = vmatpush1.msra.mxu1 %v605_v13  ;;  %v525_v11 = vld [vmem:[%s4436_s0 + $0x440] sm:$0xff]  ;;  %v294_v13 = vmul.f32 %v2719_v21, %v93_v5  ;;  %v295_v18 = vmul.f32 %v2725_v24, %v94_v10  ;;  %v127_v5 = vld [vmem:[%s4438_s2 + $0x318] sm:$0xff]  ;;  %v586_v10 = vld [vmem:[%s4436_s0 + $0x628] sm:$0xff] }
  0x55   :  { %1071 = vmatpush1.msra.mxu0 %v537_v14  ;;  %778 = vmatprep.mubr.f32.mxu0 %v262_v15  ;;  %v524_v14 = vld [vmem:[%s4436_s0 + $0x438] sm:$0xff]  ;;  %v296_v15 = vmul.f32 %v2721_v22, %v95_v7  ;;  %v124_v7 = vld [vmem:[%s4438_s2 + $0x300] sm:$0xff] }
  0x56   :  { %963 = vmatprep.mubr.f32.mxu1 %v264_v16  ;;  %1072 = vmatprep.subr.mxu0 %v536_v19  ;;  %v523_v16 = vld [vmem:[%s4436_s0 + $0x430] sm:$0xff]  ;;  %v101_v19 = vld [vmem:[%s4438_s2 + $0x248] sm:$0xff] }
  0x57   :  { %779 = vmatmul.mubr.f32.gmra.mxu0 %v261_v17  ;;  %964 = vmatmul.mubr.f32.gmra.mxu1 %v263_v20  ;;  %v293_v17 = vmul.f32 %v2723_v23, %v92_v9  ;;  %v103_v20 = vld [vmem:[%s4438_s2 + $0x258] sm:$0xff]  ;;  %v302_v35 = vmul.f32 %v2719_v21, %v101_v19 }
  0x58   :  { %1073 = vmatpush1.msra.mxu0 %v535_v26  ;;  %1253 = vmatprep.subr.mxu1 %v604_v32  ;;  %v594_v26 = vld [vmem:[%s4436_s0 + $0x668] sm:$0xff]  ;;  %v102_v32 = vld [vmem:[%s4438_s2 + $0x250] sm:$0xff]  ;;  %v576_v9 = vld [vmem:[%s4436_s0 + $0x5d8] sm:$0xff] }
  0x59   :  { %1074 = vmatprep.subr.mxu0 %v534_v33  ;;  %1254 = vmatpush1.msra.mxu1 %v603_v36  ;;  %v593_v33 = vld [vmem:[%s4436_s0 + $0x660] sm:$0xff]  ;;  %v304_v36 = vmul.f32 %v2721_v22, %v103_v20  ;;  %v303_v40 = vmul.f32 %v2725_v24, %v102_v32  ;;  %v135_v19 = vld [vmem:[%s4438_s2 + $0x358] sm:$0xff] }
  0x5a   :  { %784 = vmatprep.mubr.f32.mxu0 %v270_v34  ;;  %969 = vmatprep.mubr.f32.mxu1 %v272_v37  ;;  %v521_v34 = vld [vmem:[%s4436_s0 + $0x420] sm:$0xff]  ;;  %v301_v37 = vmul.f32 %v2723_v23, %v100_v25 }
  0x5b   :  { %1075 = vmatpush1.msra.mxu0 %v533_v38  ;;  %1255 = vmatprep.subr.mxu1 %v602_v41  ;;  %v109_v38 = vld [vmem:[%s4438_s2 + $0x288] sm:$0xff]  ;;  %v111_v41 = vld [vmem:[%s4438_s2 + $0x298] sm:$0xff] }
  0x5c   :  { %785 = vmatmul.mubr.f32.gmra.mxu0 %v269_v39  ;;  %970 = vmatmul.mubr.f32.gmra.mxu1 %v271_v42  ;;  %v520_v39 = vld [vmem:[%s4436_s0 + $0x418] sm:$0xff]  ;;  %v519_v42 = vld [vmem:[%s4436_s0 + $0x410] sm:$0xff]  ;;  %v312_v49 = vmul.f32 %v2721_v22, %v111_v41 }
  0x5d   :  { %1076 = vmatprep.subr.mxu0 %v532_v44  ;;  %1256 = vmatpush1.msra.mxu1 %v601_v46  ;;  %v592_v44 = vld [vmem:[%s4436_s0 + $0x658] sm:$0xff]  ;;  %v310_v46 = vmul.f32 %v2719_v21, %v109_v38 }
  0x5e   :  { %1077 = vmatpush1.msra.mxu0 %v531_v47  ;;  %1257 = vmatprep.subr.mxu1 %v600_v50  ;;  %v110_v47 = vld [vmem:[%s4438_s2 + $0x290] sm:$0xff]  ;;  %v517_v50 = vld [vmem:[%s4436_s0 + $0x400] sm:$0xff] }
  0x5f   :  { %790 = vmatprep.mubr.f32.mxu0 %v278_v48  ;;  %975 = vmatprep.mubr.f32.mxu1 %v280_v51  ;;  %v591_v48 = vld [vmem:[%s4436_s0 + $0x650] sm:$0xff]  ;;  %v309_v51 = vmul.f32 %v2723_v23, %v108_v43  ;;  %v311_v54 = vmul.f32 %v2725_v24, %v110_v47 }
  0x60   :  { %1078 = vmatprep.subr.mxu0 %v530_v52  ;;  %1258 = vmatpush1.msra.mxu1 %v599_v55  ;;  %v117_v52 = vld [vmem:[%s4438_s2 + $0x2c8] sm:$0xff]  ;;  %v119_v55 = vld [vmem:[%s4438_s2 + $0x2d8] sm:$0xff] }
  0x61   :  { %791 = vmatmul.mubr.f32.gmra.mxu0 %v277_v53  ;;  %976 = vmatmul.mubr.f32.gmra.mxu1 %v279_v56  ;;  %v590_v53 = vld [vmem:[%s4436_s0 + $0x648] sm:$0xff]  ;;  %v580_v56 = vld [vmem:[%s4436_s0 + $0x5f8] sm:$0xff]  ;;  %v318_v60 = vmul.f32 %v2719_v21, %v117_v52 }
  0x62   :  { %1079 = vmatpush1.msra.mxu0 %v529_v58  ;;  %1259 = vmatprep.subr.mxu1 %v598_v62  ;;  %v589_v58 = vld [vmem:[%s4436_s0 + $0x640] sm:$0xff]  ;;  %v588_v62 = vld [vmem:[%s4436_s0 + $0x638] sm:$0xff] }
  0x63   :  { %1080 = vmatprep.subr.mxu0 %v528_v61  ;;  %796 = vmatprep.mubr.f32.mxu0 %v286_v63  ;;  %v118_v61 = vld [vmem:[%s4438_s2 + $0x2d0] sm:$0xff]  ;;  %v320_v63 = vmul.f32 %v2721_v22, %v119_v55 }
  0x64   :  { %1081 = vmatpush1.msra.mxu0 %v527_v0  ;;  %981 = vmatprep.mubr.f32.mxu1 %v288_v1  ;;  %v578_v0 = vld [vmem:[%s4436_s0 + $0x5e8] sm:$0xff]  ;;  %v317_v1 = vmul.f32 %v2723_v23, %v116_v57 }
  0x65   :  { %1260 = vmatpush1.msra.mxu1 %v597_v2  ;;  %797 = vmatmul.mubr.f32.gmra.mxu0 %v285_v3  ;;  %v125_v2 = vld [vmem:[%s4438_s2 + $0x308] sm:$0xff]  ;;  %v587_v3 = vld [vmem:[%s4436_s0 + $0x630] sm:$0xff] }
  0x66   :  { %982 = vmatmul.mubr.f32.gmra.mxu1 %v287_v4  ;;  %1082 = vmatprep.subr.mxu0 %v526_v6  ;;  %v319_v4 = vmul.f32 %v2725_v24, %v118_v61  ;;  %v577_v6 = vld [vmem:[%s4436_s0 + $0x5e0] sm:$0xff] }
  0x67   :  { %1261 = vmatprep.subr.mxu1 %v596_v8  ;;  %1083 = vmatpush1.msra.mxu0 %v525_v11  ;;  %v126_v8 = vld [vmem:[%s4438_s2 + $0x310] sm:$0xff]  ;;  %v326_v11 = vmul.f32 %v2719_v21, %v125_v2 }
  0x68   :  { %1262 = vmatpush1.msra.mxu1 %v595_v12  ;;  %1084 = vmatprep.subr.mxu0 %v524_v14  ;;  %v575_v12 = vld [vmem:[%s4436_s0 + $0x5d0] sm:$0xff]  ;;  %v585_v14 = vld [vmem:[%s4436_s0 + $0x620] sm:$0xff] }
  0x69   :  { %802 = vmatprep.mubr.f32.mxu0 %v294_v13  ;;  %987 = vmatprep.mubr.f32.mxu1 %v296_v15  ;;  %v328_v13 = vmul.f32 %v2721_v22, %v127_v5  ;;  %v325_v15 = vmul.f32 %v2723_v23, %v124_v7 }
  0x6a   :  { %1085 = vmatpush1.msra.mxu0 %v523_v16  ;;  %988 = vmatmul.mubr.f32.gmra.mxu1 %v295_v18  ;;  %v327_v16 = vmul.f32 %v2725_v24, %v126_v8  ;;  %v574_v18 = vld [vmem:[%s4436_s0 + $0x5c8] sm:$0xff] }
  0x6b   :  { %803 = vmatmul.mubr.f32.gmra.mxu0 %v293_v17  ;;  %1263 = vmatprep.subr.mxu1 %v594_v26  ;;  %v133_v17 = vld [vmem:[%s4438_s2 + $0x348] sm:$0xff] }
  0x6c   :  { %1086 = vmatprep.subr.mxu0 %v522_v31  ;;  %1264 = vmatpush1.msra.mxu1 %v593_v33 }
  0x6d   :  { %1087 = vmatpush1.msra.mxu0 %v521_v34  ;;  %808 = vmatprep.mubr.f32.mxu0 %v302_v35 }
  0x6e   :  { %993 = vmatprep.mubr.f32.mxu1 %v304_v36  ;;  %1088 = vmatprep.subr.mxu0 %v520_v39 }
  0x6f   :  { %809 = vmatmul.mubr.f32.gmra.mxu0 %v301_v37  ;;  %994 = vmatmul.mubr.f32.gmra.mxu1 %v303_v40 }
  0x70   :  { %1089 = vmatpush1.msra.mxu0 %v519_v42  ;;  %1265 = vmatprep.subr.mxu1 %v592_v44 }
  0x71   :  { %1090 = vmatprep.subr.mxu0 %v518_v45  ;;  %1266 = vmatpush1.msra.mxu1 %v591_v48 }
  0x72   :  { %814 = vmatprep.mubr.f32.mxu0 %v310_v46  ;;  %999 = vmatprep.mubr.f32.mxu1 %v312_v49 }
  0x73   :  { %1091 = vmatpush1.msra.mxu0 %v517_v50  ;;  %1267 = vmatprep.subr.mxu1 %v590_v53 }
  0x74   :  { %815 = vmatmul.mubr.f32.gmra.mxu0 %v309_v51  ;;  %1000 = vmatmul.mubr.f32.gmra.mxu1 %v311_v54 }
  0x75   :  { %1092 = vmatprep.subr.mxu0 %v580_v56  ;;  %1268 = vmatpush1.msra.mxu1 %v589_v58 }
  0x76   :  { %1093 = vmatpush2.msra.mxu0 %v579_v59  ;;  %1269 = vmatprep.subr.mxu1 %v588_v62 }
  0x77   :  { %820 = vmatprep.mubr.f32.mxu0 %v318_v60  ;;  %1005 = vmatprep.mubr.f32.mxu1 %v320_v63 }
  0x78   :  { %1094 = vmatprep.subr.mxu0 %v578_v0  ;;  %1270 = vmatpush1.msra.mxu1 %v587_v3 }
  0x79   :  { %821 = vmatmul.mubr.f32.gmra.mxu0 %v317_v1  ;;  %1006 = vmatmul.mubr.f32.gmra.mxu1 %v319_v4 }
  0x7a   :  { %1095 = vmatpush2.msra.mxu0 %v577_v6  ;;  %1271 = vmatprep.subr.mxu1 %v586_v10 }
  0x7b   :  { %1096 = vmatprep.subr.mxu0 %v576_v9 }
  0x7c   :  { %10 = vsyncpa [#allocation3], 0  ;;  %1097 = vmatpush2.msra.mxu0 %v575_v12  ;;  %826 = vmatprep.mubr.f32.mxu0 %v326_v11  ;;  %v584_v20 = vld [vmem:[%s4436_s0 + $0x618] sm:$0xff]  ;;  %v132_v25 = vld [vmem:[%s4438_s2 + $0x340] sm:$0xff]  ;;  %v334_v33 = vmul.f32 %v2719_v21, %v133_v17  ;;  %v336_v35 = vmul.f32 %v2721_v22, %v135_v19  ;;  %vm629_vm0 = vcmask 523264   ;;  %vm1430_vm1 = vcmask 556032  }
  0x7d   :  { %v134_v26 = vld [vmem:[%s4438_s2 + $0x350] sm:$0xff]  ;;  %1011 = vmatprep.mubr.f32.mxu1 %v328_v13  ;;  %1272 = vmatpush1.msra.mxu1 %v585_v14  ;;  %v573_v31 = vld [vmem:[%s4436_s0 + $0x5c0] sm:$0xff]  ;;  %v572_v34 = vld [vmem:[%s4436_s0 + $0x5b8] sm:$0xff]  ;;  %v333_v37 = vmul.f32 %v2723_v23, %v132_v25 }
  0x7e   :  { %v583_v32 = vld [vmem:[%s4436_s0 + $0x610] sm:$0xff]  ;;  %827 = vmatmul.mubr.f32.gmra.mxu0 %v325_v15  ;;  %1012 = vmatmul.mubr.f32.gmra.mxu1 %v327_v16  ;;  %v335_v38 = vmul.f32 %v2725_v24, %v134_v26  ;;  %v141_v39 = vld [vmem:[%s4438_s2 + $0x388] sm:$0xff]  ;;  %v143_v40 = vld [vmem:[%s4438_s2 + $0x398] sm:$0xff] }
  0x7f   :  { %1098 = vmatprep.subr.mxu0 %v574_v18  ;;  %1273 = vmatprep.subr.mxu1 %v584_v20  ;;  %v571_v36 = vld [vmem:[%s4436_s0 + $0x5b0] sm:$0xff]  ;;  %v140_v41 = vld [vmem:[%s4438_s2 + $0x380] sm:$0xff]  ;;  %v582_v42 = vld [vmem:[%s4436_s0 + $0x608] sm:$0xff]  ;;  %v342_v47 = vmul.f32 %v2719_v21, %v141_v39  ;;  %v344_v48 = vmul.f32 %v2721_v22, %v143_v40 }
  0x80   :  { %1099 = vmatpush2.msra.mxu0 %v573_v31  ;;  %1274 = vmatpush1.msra.mxu1 %v583_v32  ;;  %v570_v43 = vld [vmem:[%s4436_s0 + $0x5a8] sm:$0xff]  ;;  %v142_v44 = vld [vmem:[%s4438_s2 + $0x390] sm:$0xff]  ;;  %v581_v45 = vld [vmem:[%s4436_s0 + $0x600] sm:$0xff]  ;;  %v341_v49 = vmul.f32 %v2723_v23, %v140_v41 }
  0x81   :  { %1100 = vmatprep.subr.mxu0 %v572_v34  ;;  %832 = vmatprep.mubr.f32.mxu0 %v334_v33  ;;  %v569_v46 = vld [vmem:[%s4436_s0 + $0x5a0] sm:$0xff]  ;;  %v149_v50 = vld [vmem:[%s4438_s2 + $0x3c8] sm:$0xff]  ;;  %v568_v51 = vld [vmem:[%s4436_s0 + $0x598] sm:$0xff]  ;;  %v343_v52 = vmul.f32 %v2725_v24, %v142_v44 }
  0x82   :  { %1017 = vmatprep.mubr.f32.mxu1 %v336_v35  ;;  %1101 = vmatpush2.msra.mxu0 %v571_v36  ;;  %v151_v53 = vld [vmem:[%s4438_s2 + $0x3d8] sm:$0xff]  ;;  %v567_v54 = vld [vmem:[%s4436_s0 + $0x590] sm:$0xff]  ;;  %v148_v55 = vld [vmem:[%s4438_s2 + $0x3c0] sm:$0xff]  ;;  %v350_v58 = vmul.f32 %v2719_v21, %v149_v50 }
  0x83   :  { %833 = vmatmul.mubr.f32.gmra.mxu0 %v333_v37  ;;  %1018 = vmatmul.mubr.f32.gmra.mxu1 %v335_v38  ;;  %v628_v56 = vld [vmem:[%s4436_s0 + $0x778] sm:$0xff]  ;;  %v566_v57 = vld [vmem:[%s4436_s0 + $0x588] sm:$0xff]  ;;  %v150_v59 = vld [vmem:[%s4438_s2 + $0x3d0] sm:$0xff]  ;;  %v352_v61 = vmul.f32 %v2721_v22, %v151_v53  ;;  %v349_v63 = vmul.f32 %v2723_v23, %v148_v55 }
  0x84   :  { %1275 = vmatprep.subr.mxu1 %v582_v42  ;;  %1102 = vmatprep.subr.mxu0 %v570_v43  ;;  %v627_v60 = vld [vmem:[%s4436_s0 + $0x770] sm:$0xff]  ;;  %v565_v62 = vld [vmem:[%s4436_s0 + $0x580] sm:$0xff]  ;;  %v157_v0 = vld [vmem:[%s4438_s2 + $0x408] sm:$0xff]  ;;  %v351_v2 = vmul.f32 %v2725_v24, %v150_v59 }
  0x85   :  { %1276 = vmatpush1.msra.mxu1 %v581_v45  ;;  %1103 = vmatpush2.msra.mxu0 %v569_v46  ;;  %v626_v1 = vld [vmem:[%s4436_s0 + $0x768] sm:$0xff]  ;;  %v159_v3 = vld [vmem:[%s4438_s2 + $0x418] sm:$0xff]  ;;  %v156_v5 = vld [vmem:[%s4438_s2 + $0x400] sm:$0xff]  ;;  %v358_v8 = vmul.f32 %v2719_v21, %v157_v0 }
  0x86   :  { %838 = vmatprep.mubr.f32.mxu0 %v342_v47  ;;  %1023 = vmatprep.mubr.f32.mxu1 %v344_v48  ;;  %v564_v4 = vld [vmem:[%s4436_s0 + $0x578] sm:$0xff]  ;;  %v625_v6 = vld [vmem:[%s4436_s0 + $0x760] sm:$0xff]  ;;  %v563_v7 = vld [vmem:[%s4436_s0 + $0x570] sm:$0xff]  ;;  %v360_v11 = vmul.f32 %v2721_v22, %v159_v3  ;;  %v357_v13 = vmul.f32 %v2723_v23, %v156_v5 }
  0x87   :  { %1104 = vmatprep.subr.mxu0 %v568_v51  ;;  %839 = vmatmul.mubr.f32.gmra.mxu0 %v341_v49  ;;  %v158_v9 = vld [vmem:[%s4438_s2 + $0x410] sm:$0xff]  ;;  %v624_v10 = vld [vmem:[%s4436_s0 + $0x758] sm:$0xff]  ;;  %v562_v12 = vld [vmem:[%s4436_s0 + $0x568] sm:$0xff] }
  0x88   :  { %1024 = vmatmul.mubr.f32.gmra.mxu1 %v343_v52  ;;  %1105 = vmatpush2.msra.mxu0 %v567_v54  ;;  %v165_v14 = vld [vmem:[%s4438_s2 + $0x448] sm:$0xff]  ;;  %v623_v15 = vld [vmem:[%s4436_s0 + $0x750] sm:$0xff]  ;;  %v359_v16 = vmul.f32 %v2725_v24, %v158_v9  ;;  %v167_v17 = vld [vmem:[%s4438_s2 + $0x458] sm:$0xff] }
  0x89   :  { %1293 = vmatprep.subr.mxu1 %v628_v56  ;;  %1106 = vmatprep.subr.mxu0 %v566_v57  ;;  %v561_v18 = vld [vmem:[%s4436_s0 + $0x560] sm:$0xff]  ;;  %v166_v20 = vld [vmem:[%s4438_s2 + $0x450] sm:$0xff]  ;;  %v560_v25 = vld [vmem:[%s4436_s0 + $0x558] sm:$0xff]  ;;  %v366_v31 = vmul.f32 %v2719_v21, %v165_v14  ;;  %v368_v33 = vmul.f32 %v2721_v22, %v167_v17 }
  0x8a   :  { %1294 = vmatpush2.msra.mxu1 %v627_v60  ;;  %844 = vmatprep.mubr.f32.mxu0 %v350_v58  ;;  %v164_v19 = vld [vmem:[%s4438_s2 + $0x440] sm:$0xff]  ;;  %v622_v26 = vld [vmem:[%s4436_s0 + $0x748] sm:$0xff]  ;;  %v559_v32 = vld [vmem:[%s4436_s0 + $0x550] sm:$0xff]  ;;  %v367_v36 = vmul.f32 %v2725_v24, %v166_v20 }
  0x8b   :  { %1029 = vmatprep.mubr.f32.mxu1 %v352_v61  ;;  %1107 = vmatpush2.msra.mxu0 %v565_v62  ;;  %v621_v34 = vld [vmem:[%s4436_s0 + $0x740] sm:$0xff]  ;;  %v365_v35 = vmul.f32 %v2723_v23, %v164_v19  ;;  %v173_v37 = vld [vmem:[%s4438_s2 + $0x488] sm:$0xff]  ;;  %v175_v39 = vld [vmem:[%s4438_s2 + $0x498] sm:$0xff] }
  0x8c   :  { %1295 = vmatprep.subr.mxu1 %v626_v1  ;;  %845 = vmatmul.mubr.f32.gmra.mxu0 %v349_v63  ;;  %v558_v38 = vld [vmem:[%s4436_s0 + $0x548] sm:$0xff]  ;;  %v620_v40 = vld [vmem:[%s4436_s0 + $0x738] sm:$0xff]  ;;  %v172_v41 = vld [vmem:[%s4438_s2 + $0x480] sm:$0xff]  ;;  %v374_v45 = vmul.f32 %v2719_v21, %v173_v37  ;;  %v376_v47 = vmul.f32 %v2721_v22, %v175_v39 }
  0x8d   :  { %1030 = vmatmul.mubr.f32.gmra.mxu1 %v351_v2  ;;  %1108 = vmatprep.subr.mxu0 %v564_v4  ;;  %v174_v42 = vld [vmem:[%s4438_s2 + $0x490] sm:$0xff]  ;;  %v557_v43 = vld [vmem:[%s4436_s0 + $0x540] sm:$0xff]  ;;  %v556_v46 = vld [vmem:[%s4436_s0 + $0x538] sm:$0xff]  ;;  %v373_v49 = vmul.f32 %v2723_v23, %v172_v41 }
  0x8e   :  { %1296 = vmatpush2.msra.mxu1 %v625_v6  ;;  %1109 = vmatpush2.msra.mxu0 %v563_v7  ;;  %v619_v44 = vld [vmem:[%s4436_s0 + $0x730] sm:$0xff]  ;;  %v375_v50 = vmul.f32 %v2725_v24, %v174_v42  ;;  %v181_v51 = vld [vmem:[%s4438_s2 + $0x4c8] sm:$0xff]  ;;  %v183_v52 = vld [vmem:[%s4438_s2 + $0x4d8] sm:$0xff] }
  0x8f   :  { %1297 = vmatprep.subr.mxu1 %v624_v10  ;;  %850 = vmatprep.mubr.f32.mxu0 %v358_v8  ;;  %v555_v48 = vld [vmem:[%s4436_s0 + $0x530] sm:$0xff]  ;;  %v180_v53 = vld [vmem:[%s4438_s2 + $0x4c0] sm:$0xff]  ;;  %v618_v54 = vld [vmem:[%s4436_s0 + $0x728] sm:$0xff]  ;;  %v382_v59 = vmul.f32 %v2719_v21, %v181_v51  ;;  %v384_v60 = vmul.f32 %v2721_v22, %v183_v52 }
  0x90   :  { %1035 = vmatprep.mubr.f32.mxu1 %v360_v11  ;;  %1110 = vmatprep.subr.mxu0 %v562_v12  ;;  %v554_v55 = vld [vmem:[%s4436_s0 + $0x528] sm:$0xff]  ;;  %v182_v56 = vld [vmem:[%s4438_s2 + $0x4d0] sm:$0xff]  ;;  %v617_v57 = vld [vmem:[%s4436_s0 + $0x720] sm:$0xff]  ;;  %v381_v61 = vmul.f32 %v2723_v23, %v180_v53 }
  0x91   :  { %1298 = vmatpush2.msra.mxu1 %v623_v15  ;;  %851 = vmatmul.mubr.f32.gmra.mxu0 %v357_v13  ;;  %v553_v58 = vld [vmem:[%s4436_s0 + $0x520] sm:$0xff]  ;;  %v552_v62 = vld [vmem:[%s4436_s0 + $0x518] sm:$0xff]  ;;  %v383_v63 = vmul.f32 %v2725_v24, %v182_v56  ;;  %v33_v0 = vld [vmem:[%s4438_s2 + $0x28] sm:$0xff] }
  0x92   :  { %1036 = vmatmul.mubr.f32.gmra.mxu1 %v359_v16  ;;  %1111 = vmatpush2.msra.mxu0 %v561_v18  ;;  %v551_v21 = vld [vmem:[%s4436_s0 + $0x510] sm:$0xff]  ;;  %v616_v22 = vld [vmem:[%s4436_s0 + $0x718] sm:$0xff]  ;;  %v32_v23 = vld [vmem:[%s4438_s2 + $0x20] sm:$0xff]  ;;  %v234_v5 = vmul.f32 %v2733_v27, %v33_v0 }
  0x93   :  { %1112 = vmatprep.subr.mxu0 %v560_v25  ;;  %1299 = vmatprep.subr.mxu1 %v622_v26  ;;  %v550_v24 = vld [vmem:[%s4436_s0 + $0x508] sm:$0xff]  ;;  %v35_v1 = vld [vmem:[%s4438_s2 + $0x38] sm:$0xff]  ;;  %v615_v3 = vld [vmem:[%s4436_s0 + $0x710] sm:$0xff]  ;;  %v233_v8 = vmul.f32 %v2735_v28, %v32_v23 }
  0x94   :  { %1113 = vmatpush2.msra.mxu0 %v559_v32  ;;  %856 = vmatprep.mubr.f32.mxu0 %v366_v31  ;;  %v41_v2 = vld [vmem:[%s4438_s2 + $0x68] sm:$0xff]  ;;  %v549_v4 = vld [vmem:[%s4436_s0 + $0x500] sm:$0xff]  ;;  %v34_v6 = vld [vmem:[%s4438_s2 + $0x30] sm:$0xff]  ;;  %v236_v11 = vmul.f32 %v2737_v29, %v35_v1 }
  0x95   :  { %1041 = vmatprep.mubr.f32.mxu1 %v368_v33  ;;  %1300 = vmatpush2.msra.mxu1 %v621_v34  ;;  %v614_v7 = vld [vmem:[%s4436_s0 + $0x708] sm:$0xff]  ;;  %v43_v9 = vld [vmem:[%s4438_s2 + $0x78] sm:$0xff]  ;;  %v613_v10 = vld [vmem:[%s4436_s0 + $0x700] sm:$0xff]  ;;  %v242_v12 = vmul.f32 %v2733_v27, %v41_v2  ;;  %v235_v14 = vmul.f32 %v2739_v30, %v34_v6 }
  0x96   :  { %857 = vmatmul.mubr.f32.gmra.mxu0 %v365_v35  ;;  %1042 = vmatmul.mubr.f32.gmra.mxu1 %v367_v36  ;;  %v40_v13 = vld [vmem:[%s4438_s2 + $0x60] sm:$0xff]  ;;  %v49_v15 = vld [vmem:[%s4438_s2 + $0xa8] sm:$0xff]  ;;  %v244_v16 = vmul.f32 %v2737_v29, %v43_v9  ;;  %v42_v17 = vld [vmem:[%s4438_s2 + $0x70] sm:$0xff] }
  0x97   :  { %1114 = vmatprep.subr.mxu0 %v558_v38  ;;  %1301 = vmatprep.subr.mxu1 %v620_v40  ;;  %v241_v18 = vmul.f32 %v2735_v28, %v40_v13  ;;  %v51_v19 = vld [vmem:[%s4438_s2 + $0xb8] sm:$0xff]  ;;  %v250_v20 = vmul.f32 %v2733_v27, %v49_v15  ;;  %v48_v25 = vld [vmem:[%s4438_s2 + $0xa0] sm:$0xff]  ;;  %v243_v26 = vmul.f32 %v2739_v30, %v42_v17  ;;  %v57_v31 = vld [vmem:[%s4438_s2 + $0xe8] sm:$0xff] }
  0x98   :  { %1115 = vmatpush2.msra.mxu0 %v557_v43  ;;  %1302 = vmatpush2.msra.mxu1 %v619_v44  ;;  %v252_v32 = vmul.f32 %v2737_v29, %v51_v19  ;;  %v50_v33 = vld [vmem:[%s4438_s2 + $0xb0] sm:$0xff]  ;;  %v249_v34 = vmul.f32 %v2735_v28, %v48_v25  ;;  %v59_v35 = vld [vmem:[%s4438_s2 + $0xf8] sm:$0xff]  ;;  %v258_v36 = vmul.f32 %v2733_v27, %v57_v31  ;;  %v56_v37 = vld [vmem:[%s4438_s2 + $0xe0] sm:$0xff] }
  0x99   :  { %1116 = vmatprep.subr.mxu0 %v556_v46  ;;  %862 = vmatprep.mubr.f32.mxu0 %v374_v45  ;;  %v251_v38 = vmul.f32 %v2739_v30, %v50_v33  ;;  %v65_v39 = vld [vmem:[%s4438_s2 + $0x128] sm:$0xff]  ;;  %v260_v40 = vmul.f32 %v2737_v29, %v59_v35  ;;  %v58_v41 = vld [vmem:[%s4438_s2 + $0xf0] sm:$0xff]  ;;  %v257_v42 = vmul.f32 %v2735_v28, %v56_v37  ;;  %v67_v43 = vld [vmem:[%s4438_s2 + $0x138] sm:$0xff] }
  0x9a   :  { %1047 = vmatprep.mubr.f32.mxu1 %v376_v47  ;;  %1117 = vmatpush2.msra.mxu0 %v555_v48  ;;  %v266_v44 = vmul.f32 %v2733_v27, %v65_v39  ;;  %v64_v45 = vld [vmem:[%s4438_s2 + $0x120] sm:$0xff]  ;;  %v259_v46 = vmul.f32 %v2739_v30, %v58_v41  ;;  %v73_v47 = vld [vmem:[%s4438_s2 + $0x168] sm:$0xff]  ;;  %v268_v48 = vmul.f32 %v2737_v29, %v67_v43  ;;  %v75_v51 = vld [vmem:[%s4438_s2 + $0x178] sm:$0xff] }
  0x9b   :  { %863 = vmatmul.mubr.f32.gmra.mxu0 %v373_v49  ;;  %1048 = vmatmul.mubr.f32.gmra.mxu1 %v375_v50  ;;  %v66_v49 = vld [vmem:[%s4438_s2 + $0x130] sm:$0xff]  ;;  %v265_v50 = vmul.f32 %v2735_v28, %v64_v45  ;;  %v274_v52 = vmul.f32 %v2733_v27, %v73_v47  ;;  %v72_v53 = vld [vmem:[%s4438_s2 + $0x160] sm:$0xff]  ;;  %v276_v56 = vmul.f32 %v2737_v29, %v75_v51  ;;  %v91_v23 = vld [vmem:[%s4438_s2 + $0x1f8] sm:$0xff] }
  0x9c   :  { %1303 = vmatprep.subr.mxu1 %v618_v54  ;;  %1118 = vmatprep.subr.mxu0 %v554_v55  ;;  %v267_v54 = vmul.f32 %v2739_v30, %v66_v49  ;;  %v81_v55 = vld [vmem:[%s4438_s2 + $0x1a8] sm:$0xff]  ;;  %v88_v1 = vld [vmem:[%s4438_s2 + $0x1e0] sm:$0xff]  ;;  %v98_v13 = vld [vmem:[%s4438_s2 + $0x230] sm:$0xff]  ;;  %v2280_v49 = vmov 0  }
  0x9d   :  { %1304 = vmatpush2.msra.mxu1 %v617_v57  ;;  %1119 = vmatpush2.msra.mxu0 %v553_v58  ;;  %v74_v57 = vld [vmem:[%s4438_s2 + $0x170] sm:$0xff]  ;;  %v273_v58 = vmul.f32 %v2735_v28, %v72_v53  ;;  %v289_v6 = vmul.f32 %v2735_v28, %v88_v1  ;;  %v96_v9 = vld [vmem:[%s4438_s2 + $0x220] sm:$0xff]  ;;  %v107_v15 = vld [vmem:[%s4438_s2 + $0x278] sm:$0xff] }
  0x9e   :  { %868 = vmatprep.mubr.f32.mxu0 %v382_v59  ;;  %1053 = vmatprep.mubr.f32.mxu1 %v384_v60  ;;  %v83_v59 = vld [vmem:[%s4438_s2 + $0x1b8] sm:$0xff]  ;;  %v282_v60 = vmul.f32 %v2733_v27, %v81_v55  ;;  %v104_v17 = vld [vmem:[%s4438_s2 + $0x260] sm:$0xff]  ;;  %v113_v19 = vld [vmem:[%s4438_s2 + $0x2a8] sm:$0xff] }
  0x9f   :  { %1120 = vmatprep.subr.mxu0 %v552_v62  ;;  %869 = vmatmul.mubr.f32.gmra.mxu0 %v381_v61  ;;  %v80_v61 = vld [vmem:[%s4438_s2 + $0x1a0] sm:$0xff]  ;;  %v275_v62 = vmul.f32 %v2739_v30, %v74_v57  ;;  %v284_v0 = vmul.f32 %v2737_v29, %v83_v59  ;;  %v106_v25 = vld [vmem:[%s4438_s2 + $0x270] sm:$0xff]  ;;  %v115_v31 = vld [vmem:[%s4438_s2 + $0x2b8] sm:$0xff] }
  0xa0   :  { %1054 = vmatmul.mubr.f32.gmra.mxu1 %v383_v63  ;;  %1121 = vmatpush2.msra.mxu0 %v551_v21  ;;  %v89_v63 = vld [vmem:[%s4438_s2 + $0x1e8] sm:$0xff]  ;;  %v82_v21 = vld [vmem:[%s4438_s2 + $0x1b0] sm:$0xff]  ;;  %v112_v33 = vld [vmem:[%s4438_s2 + $0x2a0] sm:$0xff] }
  0xa1   :  { %1305 = vmatprep.subr.mxu1 %v616_v22  ;;  %1122 = vmatprep.subr.mxu0 %v550_v24  ;;  %v281_v22 = vmul.f32 %v2735_v28, %v80_v61  ;;  %v290_v24 = vmul.f32 %v2733_v27, %v89_v63  ;;  %v283_v2 = vmul.f32 %v2739_v30, %v82_v21  ;;  %v121_v35 = vld [vmem:[%s4438_s2 + $0x2e8] sm:$0xff]  ;;  %v114_v37 = vld [vmem:[%s4438_s2 + $0x2b0] sm:$0xff]  ;;  %v123_v39 = vld [vmem:[%s4438_s2 + $0x2f8] sm:$0xff] }
  0xa2   :  { %1306 = vmatpush2.msra.mxu1 %v615_v3  ;;  %1123 = vmatpush2.msra.mxu0 %v549_v4  ;;  %v97_v3 = vld [vmem:[%s4438_s2 + $0x228] sm:$0xff]  ;;  %v292_v4 = vmul.f32 %v2737_v29, %v91_v23  ;;  %v120_v41 = vld [vmem:[%s4438_s2 + $0x2e0] sm:$0xff]  ;;  %v122_v45 = vld [vmem:[%s4438_s2 + $0x2f0] sm:$0xff] }
  0xa3   :  { %1124 = vmatprep.mubr.f32.mxu0 %v234_v5  ;;  %1307 = vmatprep.subr.mxu1 %v614_v7  ;;  %v90_v5 = vld [vmem:[%s4438_s2 + $0x1f0] sm:$0xff]  ;;  %v99_v7 = vld [vmem:[%s4438_s2 + $0x238] sm:$0xff]  ;;  %v129_v43 = vld [vmem:[%s4438_s2 + $0x328] sm:$0xff]  ;;  %v321_v47 = vmul.f32 %v2735_v28, %v120_v41 }
  0xa4   :  { %1125 = vmatmul.mubr.f32.vlgmr.msra.gmra.mxu0 %v233_v8  ;;  %1308 = vmatpush2.msra.mxu1 %v613_v10  ;;  %v298_v8 = vmul.f32 %v2733_v27, %v97_v3  ;;  %v291_v10 = vmul.f32 %v2739_v30, %v90_v5  ;;  %v128_v51 = vld [vmem:[%s4438_s2 + $0x320] sm:$0xff]  ;;  %v137_v53 = vld [vmem:[%s4438_s2 + $0x368] sm:$0xff]  ;;  %v130_v55 = vld [vmem:[%s4438_s2 + $0x330] sm:$0xff] }
  0xa5   :  { %2188 = vmatprep.mubr.msk.f32.mxu1 %vm629_vm0, %v236_v11  ;;  %1130 = vmatprep.mubr.f32.mxu0 %v242_v12  ;;  %v105_v11 = vld [vmem:[%s4438_s2 + $0x268] sm:$0xff]  ;;  %v300_v12 = vmul.f32 %v2737_v29, %v99_v7  ;;  %v139_v57 = vld [vmem:[%s4438_s2 + $0x378] sm:$0xff]  ;;  %v136_v59 = vld [vmem:[%s4438_s2 + $0x360] sm:$0xff] }
  0xa6   :  { %1310 = vmatmul.mubr.f32.vlgmr.msra.gmra.mxu1 %v235_v14  ;;  %v297_v14 = vmul.f32 %v2735_v28, %v96_v9  ;;  %2212 = vset.pattern.permute.xlu1 %v2280_v49  ;;  %v145_v61 = vld [vmem:[%s4438_s2 + $0x3a8] sm:$0xff]  ;;  %v138_v63 = vld [vmem:[%s4438_s2 + $0x370] sm:$0xff]  ;;  %v147_v21 = vld [vmem:[%s4438_s2 + $0x3b8] sm:$0xff] }
  0xa7   :  { %2189 = vmatprep.mubr.msk.f32.mxu1 %vm629_vm0, %v244_v16  ;;  %v306_v16 = vmul.f32 %v2733_v27, %v105_v11  ;;  %2213 = vset.pattern.permute.xlu0 %v2280_v49  ;;  %v144_v23 = vld [vmem:[%s4438_s2 + $0x3a0] sm:$0xff]  ;;  %v153_v1 = vld [vmem:[%s4438_s2 + $0x3e8] sm:$0xff]  ;;  %v146_v3 = vld [vmem:[%s4438_s2 + $0x3b0] sm:$0xff] }
  0xa8   :  { %1131 = vmatmul.mubr.f32.gmra.mxu0 %v241_v18  ;;  %v299_v18 = vmul.f32 %v2739_v30, %v98_v13  ;;  %v155_v5 = vld [vmem:[%s4438_s2 + $0x3f8] sm:$0xff]  ;;  %v152_v7 = vld [vmem:[%s4438_s2 + $0x3e0] sm:$0xff]  ;;  %v161_v9 = vld [vmem:[%s4438_s2 + $0x428] sm:$0xff] }
  0xa9   :  { %1136 = vmatprep.mubr.f32.mxu0 %v250_v20  ;;  %v308_v20 = vmul.f32 %v2737_v29, %v107_v15  ;;  %v154_v11 = vld [vmem:[%s4438_s2 + $0x3f0] sm:$0xff]  ;;  %v163_v13 = vld [vmem:[%s4438_s2 + $0x438] sm:$0xff]  ;;  %v160_v15 = vld [vmem:[%s4438_s2 + $0x420] sm:$0xff] }
  0xaa   :  { %1316 = vmatmul.mubr.f32.gmra.mxu1 %v243_v26  ;;  %v305_v26 = vmul.f32 %v2735_v28, %v104_v17  ;;  %v169_v17 = vld [vmem:[%s4438_s2 + $0x468] sm:$0xff] }
  0xab   :  { %2190 = vmatprep.mubr.msk.f32.mxu1 %vm629_vm0, %v252_v32  ;;  %v314_v32 = vmul.f32 %v2733_v27, %v113_v19  ;;  %v162_v19 = vld [vmem:[%s4438_s2 + $0x430] sm:$0xff]  ;;  %v185_v41 = vld [vmem:[%s4438_s2 + $0x4e8] sm:$0xff] }
  0xac   :  { %1137 = vmatmul.mubr.f32.gmra.mxu0 %v249_v34  ;;  %v307_v34 = vmul.f32 %v2739_v30, %v106_v25  ;;  %v171_v25 = vld [vmem:[%s4438_s2 + $0x478] sm:$0xff] }
  0xad   :  { %1142 = vmatprep.mubr.f32.mxu0 %v258_v36  ;;  %v316_v36 = vmul.f32 %v2737_v29, %v115_v31  ;;  %v168_v31 = vld [vmem:[%s4438_s2 + $0x460] sm:$0xff] }
  0xae   :  { %1322 = vmatmul.mubr.f32.gmra.mxu1 %v251_v38  ;;  %v313_v38 = vmul.f32 %v2735_v28, %v112_v33  ;;  %v177_v33 = vld [vmem:[%s4438_s2 + $0x4a8] sm:$0xff] }
  0xaf   :  { %2191 = vmatprep.mubr.msk.f32.mxu1 %vm629_vm0, %v260_v40  ;;  %v322_v40 = vmul.f32 %v2733_v27, %v121_v35  ;;  %v170_v35 = vld [vmem:[%s4438_s2 + $0x470] sm:$0xff] }
  0xb0   :  { %1143 = vmatmul.mubr.f32.gmra.mxu0 %v257_v42  ;;  %v315_v42 = vmul.f32 %v2739_v30, %v114_v37  ;;  %v179_v37 = vld [vmem:[%s4438_s2 + $0x4b8] sm:$0xff] }
  0xb1   :  { %1148 = vmatprep.mubr.f32.mxu0 %v266_v44  ;;  %v324_v44 = vmul.f32 %v2737_v29, %v123_v39  ;;  %v176_v39 = vld [vmem:[%s4438_s2 + $0x4a0] sm:$0xff] }
  0xb2   :  { %1328 = vmatmul.mubr.f32.gmra.mxu1 %v259_v46  ;;  %v1971_v46 = vld [vmem:[%s4440_s4] sm:$0xff] }
  0xb3   :  { %2192 = vmatprep.mubr.msk.f32.mxu1 %vm629_vm0, %v268_v48  ;;  %v131_v48 = vld [vmem:[%s4438_s2 + $0x338] sm:$0xff]  ;;  %1993 = vperm.xlu1 %2212, %v1971_v46   ;;  %v386_v46 = vmul.f32 %v2733_v27, %v185_v41 }
  0xb4   :  { %1149 = vmatmul.mubr.f32.gmra.mxu0 %v265_v50  ;;  %v330_v50 = vmul.f32 %v2733_v27, %v129_v43  ;;  %v178_v43 = vld [vmem:[%s4438_s2 + $0x4b0] sm:$0xff] }
  0xb5   :  { %1154 = vmatprep.mubr.f32.mxu0 %v274_v52  ;;  %v323_v52 = vmul.f32 %v2739_v30, %v122_v45  ;;  %v187_v45 = vld [vmem:[%s4438_s2 + $0x4f8] sm:$0xff] }
  0xb6   :  { %1334 = vmatmul.mubr.f32.gmra.mxu1 %v267_v54  ;;  %v332_v54 = vmul.f32 %v2737_v29, %v131_v48  ;;  %v379_v48 = vmul.f32 %v2739_v30, %v178_v43  ;;  %v388_v49 = vmul.f32 %v2737_v29, %v187_v45 }
  0xb7   :  { %2193 = vmatprep.mubr.msk.f32.mxu1 %vm629_vm0, %v276_v56  ;;  %v329_v56 = vmul.f32 %v2735_v28, %v128_v51 }
  0xb8   :  { %1155 = vmatmul.mubr.f32.gmra.mxu0 %v273_v58  ;;  %v338_v58 = vmul.f32 %v2733_v27, %v137_v53 }
  0xb9   :  { %1160 = vmatprep.mubr.f32.mxu0 %v282_v60  ;;  %v331_v60 = vmul.f32 %v2739_v30, %v130_v55 }
  0xba   :  { %1340 = vmatmul.mubr.f32.gmra.mxu1 %v275_v62  ;;  %v340_v62 = vmul.f32 %v2737_v29, %v139_v57 }
  0xbb   :  { %2194 = vmatprep.mubr.msk.f32.mxu1 %vm629_vm0, %v284_v0  ;;  %v337_v0 = vmul.f32 %v2735_v28, %v136_v59 }
  0xbc   :  { %1161 = vmatmul.mubr.f32.gmra.mxu0 %v281_v22  ;;  %v346_v22 = vmul.f32 %v2733_v27, %v145_v61 }
  0xbd   :  { %1166 = vmatprep.mubr.f32.mxu0 %v290_v24  ;;  %v339_v24 = vmul.f32 %v2739_v30, %v138_v63 }
  0xbe   :  { %1346 = vmatmul.mubr.f32.gmra.mxu1 %v283_v2  ;;  %v348_v2 = vmul.f32 %v2737_v29, %v147_v21 }
  0xbf   :  { %2195 = vmatprep.mubr.msk.f32.mxu1 %vm629_vm0, %v292_v4  ;;  %v345_v4 = vmul.f32 %v2735_v28, %v144_v23 }
  0xc0   :  { %1167 = vmatmul.mubr.f32.gmra.mxu0 %v289_v6  ;;  %v354_v6 = vmul.f32 %v2733_v27, %v153_v1 }
  0xc1   :  { %1172 = vmatprep.mubr.f32.mxu0 %v298_v8  ;;  %v347_v8 = vmul.f32 %v2739_v30, %v146_v3 }
  0xc2   :  { %1352 = vmatmul.mubr.f32.gmra.mxu1 %v291_v10  ;;  %v356_v10 = vmul.f32 %v2737_v29, %v155_v5 }
  0xc3   :  { %2196 = vmatprep.mubr.msk.f32.mxu1 %vm629_vm0, %v300_v12  ;;  %v353_v12 = vmul.f32 %v2735_v28, %v152_v7 }
  0xc4   :  { %1173 = vmatmul.mubr.f32.gmra.mxu0 %v297_v14  ;;  %v362_v14 = vmul.f32 %v2733_v27, %v161_v9 }
  0xc5   :  { %1178 = vmatprep.mubr.f32.mxu0 %v306_v16  ;;  %v355_v16 = vmul.f32 %v2739_v30, %v154_v11 }
  0xc6   :  { %1358 = vmatmul.mubr.f32.gmra.mxu1 %v299_v18  ;;  %v364_v18 = vmul.f32 %v2737_v29, %v163_v13 }
  0xc7   :  { %2197 = vmatprep.mubr.msk.f32.mxu1 %vm629_vm0, %v308_v20  ;;  %v361_v20 = vmul.f32 %v2735_v28, %v160_v15 }
  0xc8   :  { %1179 = vmatmul.mubr.f32.gmra.mxu0 %v305_v26  ;;  %v370_v26 = vmul.f32 %v2733_v27, %v169_v17 }
  0xc9   :  { %1184 = vmatprep.mubr.f32.mxu0 %v314_v32  ;;  %v363_v32 = vmul.f32 %v2739_v30, %v162_v19 }
  0xca   :  { %1364 = vmatmul.mubr.f32.gmra.mxu1 %v307_v34  ;;  %v372_v34 = vmul.f32 %v2737_v29, %v171_v25 }
  0xcb   :  { %2198 = vmatprep.mubr.msk.f32.mxu1 %vm629_vm0, %v316_v36  ;;  %v369_v36 = vmul.f32 %v2735_v28, %v168_v31 }
  0xcc   :  { %1185 = vmatmul.mubr.f32.gmra.mxu0 %v313_v38  ;;  %v378_v38 = vmul.f32 %v2733_v27, %v177_v33 }
  0xcd   :  { %1190 = vmatprep.mubr.f32.mxu0 %v322_v40  ;;  %v371_v40 = vmul.f32 %v2739_v30, %v170_v35 }
  0xce   :  { %1370 = vmatmul.mubr.f32.gmra.mxu1 %v315_v42  ;;  %v380_v42 = vmul.f32 %v2737_v29, %v179_v37 }
  0xcf   :  { %2199 = vmatprep.mubr.msk.f32.mxu1 %vm629_vm0, %v324_v44  ;;  %v377_v44 = vmul.f32 %v2735_v28, %v176_v39 }
  0xd0   :  { %1191 = vmatmul.mubr.f32.gmra.mxu0 %v321_v47  ;;  %v184_v47 = vld [vmem:[%s4438_s2 + $0x4e0] sm:$0xff] }
  0xd1   :  { %1196 = vmatprep.mubr.f32.mxu0 %v330_v50  ;;  %v186_v50 = vld [vmem:[%s4438_s2 + $0x4f0] sm:$0xff]  ;;  %v385_v51 = vmul.f32 %v2735_v28, %v184_v47 }
  0xd2   :  { %1376 = vmatmul.mubr.f32.gmra.mxu1 %v323_v52  ;;  %v387_v27 = vmul.f32 %v2739_v30, %v186_v50 }
  0xd3   :  { %2200 = vmatprep.mubr.msk.f32.mxu1 %vm629_vm0, %v332_v54 }
  0xd4   :  { %1197 = vmatmul.mubr.f32.gmra.mxu0 %v329_v56 }
  0xd5   :  { %1202 = vmatprep.mubr.f32.mxu0 %v338_v58 }
  0xd6   :  { %1382 = vmatmul.mubr.f32.gmra.mxu1 %v331_v60 }
  0xd7   :  { %2201 = vmatprep.mubr.msk.f32.mxu1 %vm629_vm0, %v340_v62 }
  0xd8   :  { %1203 = vmatmul.mubr.f32.gmra.mxu0 %v337_v0 }
  0xd9   :  { %1208 = vmatprep.mubr.f32.mxu0 %v346_v22 }
  0xda   :  { %1388 = vmatmul.mubr.f32.gmra.mxu1 %v339_v24 }
  0xdb   :  { %2202 = vmatprep.mubr.msk.f32.mxu1 %vm629_vm0, %v348_v2 }
  0xdc   :  { %1209 = vmatmul.mubr.f32.gmra.mxu0 %v345_v4 }
  0xdd   :  { %1214 = vmatprep.mubr.f32.mxu0 %v354_v6 }
  0xde   :  { %1394 = vmatmul.mubr.f32.gmra.mxu1 %v347_v8 }
  0xdf   :  { %2203 = vmatprep.mubr.msk.f32.mxu1 %vm629_vm0, %v356_v10 }
  0xe0   :  { %1215 = vmatmul.mubr.f32.gmra.mxu0 %v353_v12 }
  0xe1   :  { %1220 = vmatprep.mubr.f32.mxu0 %v362_v14 }
  0xe2   :  { %1400 = vmatmul.mubr.f32.gmra.mxu1 %v355_v16 }
  0xe3   :  { %2204 = vmatprep.mubr.msk.f32.mxu1 %vm629_vm0, %v364_v18 }
  0xe4   :  { %1221 = vmatmul.mubr.f32.gmra.mxu0 %v361_v20 }
  0xe5   :  { %1226 = vmatprep.mubr.f32.mxu0 %v370_v26 }
  0xe6   :  { %1406 = vmatmul.mubr.f32.gmra.mxu1 %v363_v32 }
  0xe7   :  { %2205 = vmatprep.mubr.msk.f32.mxu1 %vm629_vm0, %v372_v34 }
  0xe8   :  { %1227 = vmatmul.mubr.f32.gmra.mxu0 %v369_v36 }
  0xe9   :  { %1232 = vmatprep.mubr.f32.mxu0 %v378_v38 }
  0xea   :  { %1412 = vmatmul.mubr.f32.gmra.mxu1 %v371_v40 }
  0xeb   :  { %2206 = vmatprep.mubr.msk.f32.mxu1 %vm629_vm0, %v380_v42 }
  0xec   :  { %1233 = vmatmul.mubr.f32.gmra.mxu0 %v377_v44 }
  0xed   :  { %1238 = vmatprep.mubr.f32.mxu0 %v386_v46 }
  0xee   :  { %1418 = vmatmul.mubr.f32.gmra.mxu1 %v379_v48 }
  0xef   :  { %2207 = vmatprep.mubr.msk.f32.mxu1 %vm629_vm0, %v388_v49 }
  0xf0   :  { %1239 = vmatmul.mubr.f32.gmra.mxu0 %v385_v51 }
  0xf2   :  { %1424 = vmatmul.mubr.f32.gmra.mxu1 %v387_v27 }
 0x105   :  { %v756_v52 = vpop.f32.mrf.mxu0 }
 0x106   :  { %v941_v53 = vpop.f32.mrf.mxu1 }
 0x107   :  { %v3716_v54 = vadd.f32 %v941_v53, %v756_v52  ;;  %v758_v29 = vpop.f32.mrf.mxu0 }
 0x108   :  { %v943_v55 = vpop.f32.mrf.mxu1 }
 0x109   :  { %v3718_v56 = vadd.f32 %v943_v55, %v758_v29 }
 0x10a   :  { %v762_v57 = vpop.f32.mrf.mxu0  ;;  %v947_v58 = vpop.f32.mrf.mxu1 }
 0x10b   :  { %v3720_v59 = vadd.f32 %v947_v58, %v762_v57 }
 0x10c   :  { %v764_v28 = vpop.f32.mrf.mxu0  ;;  %v949_v60 = vpop.f32.mrf.mxu1 }
 0x10d   :  { %v3722_v61 = vadd.f32 %v949_v60, %v764_v28 }
 0x10e   :  { %v768_v30 = vpop.f32.mrf.mxu0  ;;  %v953_v62 = vpop.f32.mrf.mxu1 }
 0x10f   :  { %v3724_v63 = vadd.f32 %v953_v62, %v768_v30 }
 0x110   :  { %v770_v0 = vpop.f32.mrf.mxu0  ;;  %v955_v21 = vpop.f32.mrf.mxu1 }
 0x111   :  { %v3726_v22 = vadd.f32 %v955_v21, %v770_v0 }
 0x112   :  { %v959_v24 = vpop.f32.mrf.mxu1 }
 0x113   :  { %v774_v23 = vpop.f32.mrf.mxu0 }
 0x114   :  { %v3728_v1 = vadd.f32 %v959_v24, %v774_v23  ;;  %v961_v3 = vpop.f32.mrf.mxu1 }
 0x115   :  { %v776_v2 = vpop.f32.mrf.mxu0 }
 0x116   :  { %v3730_v4 = vadd.f32 %v961_v3, %v776_v2 }
 0x117   :  { %v780_v5 = vpop.f32.mrf.mxu0  ;;  %v965_v6 = vpop.f32.mrf.mxu1 }
 0x118   :  { %v3732_v7 = vadd.f32 %v965_v6, %v780_v5 }
 0x119   :  { %v782_v8 = vpop.f32.mrf.mxu0  ;;  %v967_v9 = vpop.f32.mrf.mxu1 }
 0x11a   :  { %v3734_v10 = vadd.f32 %v967_v9, %v782_v8 }
 0x11c   :  { %v786_v11 = vpop.f32.mrf.mxu0  ;;  %v971_v12 = vpop.f32.mrf.mxu1 }
 0x11d   :  { %v3736_v13 = vadd.f32 %v971_v12, %v786_v11 }
 0x11e   :  { %v788_v14 = vpop.f32.mrf.mxu0  ;;  %v973_v15 = vpop.f32.mrf.mxu1 }
 0x11f   :  { %v3738_v16 = vadd.f32 %v973_v15, %v788_v14 }
 0x121   :  { %v792_v17 = vpop.f32.mrf.mxu0  ;;  %v977_v18 = vpop.f32.mrf.mxu1 }
 0x122   :  { %v3740_v19 = vadd.f32 %v977_v18, %v792_v17 }
 0x123   :  { %v794_v20 = vpop.f32.mrf.mxu0  ;;  %v979_v25 = vpop.f32.mrf.mxu1 }
 0x124   :  { %v3742_v26 = vadd.f32 %v979_v25, %v794_v20 }
 0x125   :  { %v798_v31 = vpop.f32.mrf.mxu0 }
 0x126   :  { %v983_v32 = vpop.f32.mrf.mxu1 }
 0x127   :  { %v3744_v33 = vadd.f32 %v983_v32, %v798_v31  ;;  %v800_v34 = vpop.f32.mrf.mxu0 }
 0x128   :  { %v985_v35 = vpop.f32.mrf.mxu1 }
 0x129   :  { %v3746_v36 = vadd.f32 %v985_v35, %v800_v34 }
 0x12a   :  { %v989_v38 = vpop.f32.mrf.mxu1 }
 0x12b   :  { %v804_v37 = vpop.f32.mrf.mxu0 }
 0x12c   :  { %v3748_v39 = vadd.f32 %v989_v38, %v804_v37  ;;  %v991_v41 = vpop.f32.mrf.mxu1 }
 0x12d   :  { %v806_v40 = vpop.f32.mrf.mxu0 }
 0x12e   :  { %v3750_v42 = vadd.f32 %v991_v41, %v806_v40 }
 0x12f   :  { %v810_v43 = vpop.f32.mrf.mxu0  ;;  %v995_v44 = vpop.f32.mrf.mxu1 }
 0x130   :  { %v3752_v45 = vadd.f32 %v995_v44, %v810_v43 }
 0x131   :  { %v812_v46 = vpop.f32.mrf.mxu0  ;;  %v997_v47 = vpop.f32.mrf.mxu1 }
 0x132   :  { %v3754_v48 = vadd.f32 %v997_v47, %v812_v46 }
 0x134   :  { %v816_v49 = vpop.f32.mrf.mxu0  ;;  %v1001_v50 = vpop.f32.mrf.mxu1 }
 0x135   :  { %v3756_v51 = vadd.f32 %v1001_v50, %v816_v49 }
 0x136   :  { %v818_v27 = vpop.f32.mrf.mxu0  ;;  %v1003_v52 = vpop.f32.mrf.mxu1 }
 0x137   :  { %v3758_v53 = vadd.f32 %v1003_v52, %v818_v27 }
 0x139   :  { %v822_v29 = vpop.f32.mrf.mxu0  ;;  %v1007_v55 = vpop.f32.mrf.mxu1 }
 0x13a   :  { %v3760_v57 = vadd.f32 %v1007_v55, %v822_v29 }
 0x13b   :  { %v824_v58 = vpop.f32.mrf.mxu0  ;;  %v1009_v28 = vpop.f32.mrf.mxu1 }
 0x13c   :  { %v3762_v60 = vadd.f32 %v1009_v28, %v824_v58 }
 0x13e   :  { %v828_v30 = vpop.f32.mrf.mxu0  ;;  %v1013_v62 = vpop.f32.mrf.mxu1 }
 0x13f   :  { %v3764_v0 = vadd.f32 %v1013_v62, %v828_v30 }
 0x140   :  { %v830_v21 = vpop.f32.mrf.mxu0  ;;  %v1015_v23 = vpop.f32.mrf.mxu1 }
 0x141   :  { %v3766_v24 = vadd.f32 %v1015_v23, %v830_v21 }
 0x143   :  { %v834_v2 = vpop.f32.mrf.mxu0  ;;  %v1019_v3 = vpop.f32.mrf.mxu1 }
 0x144   :  { %v3768_v5 = vadd.f32 %v1019_v3, %v834_v2 }
 0x145   :  { %v836_v6 = vpop.f32.mrf.mxu0  ;;  %v1021_v8 = vpop.f32.mrf.mxu1 }
 0x146   :  { %v3770_v9 = vadd.f32 %v1021_v8, %v836_v6 }
 0x147   :  { %v840_v11 = vpop.f32.mrf.mxu0 }
 0x148   :  { %v1025_v12 = vpop.f32.mrf.mxu1 }
 0x149   :  { %v3772_v14 = vadd.f32 %v1025_v12, %v840_v11  ;;  %v842_v15 = vpop.f32.mrf.mxu0 }
 0x14a   :  { %v1027_v17 = vpop.f32.mrf.mxu1 }
 0x14b   :  { %v3774_v18 = vadd.f32 %v1027_v17, %v842_v15 }
 0x14c   :  { %v846_v20 = vpop.f32.mrf.mxu0 }
 0x14d   :  { %v1031_v25 = vpop.f32.mrf.mxu1 }
 0x14e   :  { %v3776_v31 = vadd.f32 %v1031_v25, %v846_v20  ;;  %v848_v32 = vpop.f32.mrf.mxu0 }
 0x14f   :  { %v1033_v34 = vpop.f32.mrf.mxu1 }
 0x150   :  { %v3778_v35 = vadd.f32 %v1033_v34, %v848_v32 }
 0x151   :  { %v852_v37 = vpop.f32.mrf.mxu0 }
 0x152   :  { %v1037_v38 = vpop.f32.mrf.mxu1 }
 0x153   :  { %v3780_v40 = vadd.f32 %v1037_v38, %v852_v37  ;;  %v854_v41 = vpop.f32.mrf.mxu0 }
 0x154   :  { %v1039_v43 = vpop.f32.mrf.mxu1 }
 0x155   :  { %v3782_v44 = vadd.f32 %v1039_v43, %v854_v41 }
 0x156   :  { %v858_v46 = vpop.f32.mrf.mxu0  ;;  %v1043_v47 = vpop.f32.mrf.mxu1 }
 0x157   :  { %v3784_v49 = vadd.f32 %v1043_v47, %v858_v46 }
 0x158   :  { %v860_v50 = vpop.f32.mrf.mxu0  ;;  %v1045_v27 = vpop.f32.mrf.mxu1 }
 0x159   :  { %v3786_v52 = vadd.f32 %v1045_v27, %v860_v50 }
 0x15b   :  { %v864_v29 = vpop.f32.mrf.mxu0  ;;  %v1049_v55 = vpop.f32.mrf.mxu1 }
 0x15c   :  { %v3788_v58 = vadd.f32 %v1049_v55, %v864_v29 }
 0x15d   :  { %v866_v28 = vpop.f32.mrf.mxu0  ;;  %v1051_v30 = vpop.f32.mrf.mxu1 }
 0x15e   :  { %v3790_v62 = vadd.f32 %v1051_v30, %v866_v28 }
 0x15f   :  { %v870_v21 = vpop.f32.mrf.mxu0 }
 0x160   :  { %v1055_v23 = vpop.f32.mrf.mxu1 }
 0x161   :  { %v3792_v2 = vadd.f32 %v1055_v23, %v870_v21  ;;  %v872_v3 = vpop.f32.mrf.mxu0 }
 0x162   :  { %v1057_v6 = vpop.f32.mrf.mxu1 }
 0x163   :  { %v3794_v8 = vadd.f32 %v1057_v6, %v872_v3 }
 0x164   :  { %v1126_v11 = vpop.f32.mrf.mxu0 }
 0x165   :  { %v1127_v12 = vadd.f32 %v1126_v11, %v3716_v54 }
 0x166   :  { %v1311_v15 = vpop.f32.mrf.mxu1  ;;  %v1128_v17 = vpop.f32.mrf.mxu0 }
 0x167   :  { %v1129_v20 = vadd.f32 %v1128_v17, %v3718_v56  ;;  %v3801_v38 = vadd.f32 %v1311_v15, %v1127_v12 }
 0x168   :  { %v1313_v25 = vpop.f32.mrf.mxu1  ;;  %v1132_v32 = vpop.f32.mrf.mxu0 }
 0x169   :  { %v3798_v34 = vadd.f32 %v1313_v25, %v1129_v20  ;;  %v1133_v37 = vadd.f32 %v1132_v32, %v3720_v59  ;;  %v1511_v21 = vmul.f32 %v3801_v38, %v3801_v38 }
 0x16a   :  { %v1317_v41 = vpop.f32.mrf.mxu1  ;;  %v1134_v43 = vpop.f32.mrf.mxu0 }
 0x16b   :  { %v1135_v46 = vadd.f32 %v1134_v43, %v3722_v61  ;;  %v1431_v54 = vsel %vm1430_vm1, %v3798_v34, 0.0  ;;  %v1512_v47 = vmul.f32 %v3798_v34, %v3798_v34  ;;  %v3808_v56 = vadd.f32 %v1317_v41, %v1133_v37 }
 0x16c   :  { %v1319_v50 = vpop.f32.mrf.mxu1  ;;  %v1138_v27 = vpop.f32.mrf.mxu0  ;;  %v1432_v29 = vadd.f32 %v1431_v54, %v3801_v38 }
 0x16d   :  { %v3811_v55 = vadd.f32 %v1319_v50, %v1135_v46  ;;  %v1551_v59 = vsel %vm1430_vm1, %v1512_v47, 0.0  ;;  %v1139_v28 = vadd.f32 %v1138_v27, %v3724_v63  ;;  %v1513_v15 = vmul.f32 %v3808_v56, %v3808_v56 }
 0x16e   :  { %v1140_v30 = vpop.f32.mrf.mxu0  ;;  %v1323_v61 = vpop.f32.mrf.mxu1  ;;  %1433 = vadd.xlane.f32.xlu0 %v1432_v29  ;;  %v1552_v12 = vadd.f32 %v1551_v59, %v1511_v21 }
 0x16f   :  { %v1141_v23 = vadd.f32 %v1140_v30, %v3726_v22  ;;  %v1514_v3 = vmul.f32 %v3811_v55, %v3811_v55  ;;  %v1435_v20 = vsel %vm1430_vm1, %v3811_v55, 0.0  ;;  %v3827_v25 = vadd.f32 %v1323_v61, %v1139_v28 }
 0x170   :  { %v1144_v6 = vpop.f32.mrf.mxu0  ;;  %v1325_v11 = vpop.f32.mrf.mxu1  ;;  %v1436_v27 = vadd.f32 %v1435_v20, %v3808_v56 }
 0x171   :  { %v3822_v17 = vadd.f32 %v1325_v11, %v1141_v23  ;;  %v1555_v63 = vsel %vm1430_vm1, %v1514_v3, 0.0  ;;  %v1145_v54 = vadd.f32 %v1144_v6, %v3728_v1  ;;  %v1515_v21 = vmul.f32 %v3827_v25, %v3827_v25 }
 0x172   :  { %v1146_v32 = vpop.f32.mrf.mxu0  ;;  %v1329_v22 = vpop.f32.mrf.mxu1  ;;  %1553 = vadd.xlane.f32.xlu0 %v1552_v12  ;;  %v1556_v37 = vadd.f32 %v1555_v63, %v1513_v15 }
 0x173   :  { %v1147_v41 = vadd.f32 %v1146_v32, %v3730_v4  ;;  %v1439_v43 = vsel %vm1430_vm1, %v3822_v17, 0.0  ;;  %v1516_v46 = vmul.f32 %v3822_v17, %v3822_v17  ;;  %v3848_v6 = vadd.f32 %v1329_v22, %v1145_v54 }
 0x174   :  { %v1150_v47 = vpop.f32.mrf.mxu0  ;;  %v1331_v50 = vpop.f32.mrf.mxu1  ;;  %1557 = vadd.xlane.f32.xlu1 %v1556_v37  ;;  %v1440_v61 = vadd.f32 %v1439_v43, %v3827_v25 }
 0x175   :  { %v3836_v29 = vadd.f32 %v1331_v50, %v1147_v41  ;;  %v1559_v59 = vsel %vm1430_vm1, %v1516_v46, 0.0  ;;  %v1151_v28 = vadd.f32 %v1150_v47, %v3732_v7 }
 0x176   :  { %v1152_v4 = vpop.f32.mrf.mxu0  ;;  %v1335_v30 = vpop.f32.mrf.mxu1  ;;  %1437 = vadd.xlane.f32.xlu0 %v1436_v27  ;;  %v1560_v12 = vadd.f32 %v1559_v59, %v1515_v21  ;;  %v1517_v27 = vmul.f32 %v3848_v6, %v3848_v6 }
 0x177   :  { %v1153_v1 = vadd.f32 %v1152_v4, %v3734_v10  ;;  %v1443_v23 = vsel %vm1430_vm1, %v3836_v29, 0.0  ;;  %v1518_v3 = vmul.f32 %v3836_v29, %v3836_v29  ;;  %v3852_v63 = vadd.f32 %v1335_v30, %v1151_v28 }
 0x178   :  { %v1156_v11 = vpop.f32.mrf.mxu0  ;;  %v1337_v7 = vpop.f32.mrf.mxu1  ;;  %1441 = vadd.xlane.f32.xlu1 %v1440_v61  ;;  %v1444_v10 = vadd.f32 %v1443_v23, %v3848_v6 }
 0x179   :  { %v3850_v15 = vadd.f32 %v1337_v7, %v1153_v1  ;;  %v1563_v22 = vsel %vm1430_vm1, %v1518_v3, 0.0  ;;  %v1157_v46 = vadd.f32 %v1156_v11, %v3736_v13  ;;  %v1519_v13 = vmul.f32 %v3852_v63, %v3852_v63 }
 0x17a   :  { %v1158_v20 = vpop.f32.mrf.mxu0  ;;  %v1341_v32 = vpop.f32.mrf.mxu1  ;;  %1561 = vadd.xlane.f32.xlu0 %v1560_v12  ;;  %v1564_v61 = vadd.f32 %v1563_v22, %v1517_v27 }
 0x17b   :  { %v1159_v37 = vadd.f32 %v1158_v20, %v3738_v16  ;;  %v1447_v41 = vsel %vm1430_vm1, %v3850_v15, 0.0  ;;  %v1520_v43 = vmul.f32 %v3850_v15, %v3850_v15  ;;  %v3876_v3 = vadd.f32 %v1341_v32, %v1157_v46 }
 0x17c   :  { %v1162_v54 = vpop.f32.mrf.mxu0  ;;  %v1343_v47 = vpop.f32.mrf.mxu1  ;;  %1445 = vadd.xlane.f32.xlu1 %v1444_v10  ;;  %v1448_v50 = vadd.f32 %v1447_v41, %v3852_v63 }
 0x17d   :  { %v3865_v59 = vadd.f32 %v1343_v47, %v1159_v37  ;;  %v1567_v16 = vsel %vm1430_vm1, %v1520_v43, 0.0  ;;  %v1163_v28 = vadd.f32 %v1162_v54, %v3740_v19  ;;  %v1521_v27 = vmul.f32 %v3876_v3, %v3876_v3 }
 0x17e   :  { %v1164_v4 = vpop.f32.mrf.mxu0  ;;  %v1347_v30 = vpop.f32.mrf.mxu1  ;;  %1449 = vadd.xlane.f32.xlu0 %v1448_v50  ;;  %v1568_v19 = vadd.f32 %v1567_v16, %v1519_v13 }
 0x17f   :  { %v1165_v21 = vadd.f32 %v1164_v4, %v3742_v26  ;;  %v1451_v1 = vsel %vm1430_vm1, %v3865_v59, 0.0  ;;  %v1522_v23 = vmul.f32 %v3865_v59, %v3865_v59  ;;  %v3880_v20 = vadd.f32 %v1347_v30, %v1163_v28 }
 0x180   :  { %v1168_v11 = vpop.f32.mrf.mxu0  ;;  %v1349_v7 = vpop.f32.mrf.mxu1  ;;  %1565 = vadd.xlane.f32.xlu1 %v1564_v61  ;;  %v1452_v26 = vadd.f32 %v1451_v1, %v3876_v3 }
 0x181   :  { %v3878_v12 = vadd.f32 %v1349_v7, %v1165_v21  ;;  %v1571_v32 = vsel %vm1430_vm1, %v1522_v23, 0.0  ;;  %v1169_v46 = vadd.f32 %v1168_v11, %v3744_v33  ;;  %v1523_v33 = vmul.f32 %v3880_v20, %v3880_v20 }
 0x182   :  { %v1170_v10 = vpop.f32.mrf.mxu0  ;;  %v1353_v37 = vpop.f32.mrf.mxu1  ;;  %1569 = vadd.xlane.f32.xlu0 %v1568_v19  ;;  %v1572_v61 = vadd.f32 %v1571_v32, %v1521_v27 }
 0x183   :  { %v1171_v41 = vadd.f32 %v1170_v10, %v3746_v36  ;;  %v1455_v22 = vsel %vm1430_vm1, %v3878_v12, 0.0  ;;  %v1524_v43 = vmul.f32 %v3878_v12, %v3878_v12  ;;  %v3904_v23 = vadd.f32 %v1353_v37, %v1169_v46 }
 0x184   :  { %v1174_v54 = vpop.f32.mrf.mxu0  ;;  %v1355_v47 = vpop.f32.mrf.mxu1  ;;  %1453 = vadd.xlane.f32.xlu1 %v1452_v26  ;;  %v1456_v50 = vadd.f32 %v1455_v22, %v3880_v20 }
 0x185   :  { %v3893_v16 = vadd.f32 %v1355_v47, %v1171_v41  ;;  %v1575_v36 = vsel %vm1430_vm1, %v1524_v43, 0.0  ;;  %v1175_v28 = vadd.f32 %v1174_v54, %v3748_v39  ;;  %v1525_v27 = vmul.f32 %v3904_v23, %v3904_v23 }
 0x186   :  { %v1176_v4 = vpop.f32.mrf.mxu0  ;;  %v1359_v30 = vpop.f32.mrf.mxu1  ;;  %1457 = vadd.xlane.f32.xlu0 %v1456_v50  ;;  %v1576_v39 = vadd.f32 %v1575_v36, %v1523_v33 }
 0x187   :  { %v1177_v13 = vadd.f32 %v1176_v4, %v3750_v42  ;;  %v1459_v21 = vsel %vm1430_vm1, %v3893_v16, 0.0  ;;  %v1526_v1 = vmul.f32 %v3893_v16, %v3893_v16  ;;  %v3908_v10 = vadd.f32 %v1359_v30, %v1175_v28 }
 0x188   :  { %v1180_v11 = vpop.f32.mrf.mxu0  ;;  %v1361_v7 = vpop.f32.mrf.mxu1  ;;  %1573 = vadd.xlane.f32.xlu1 %v1572_v61  ;;  %v1460_v42 = vadd.f32 %v1459_v21, %v3904_v23 }
 0x189   :  { %v3906_v19 = vadd.f32 %v1361_v7, %v1177_v13  ;;  %v1579_v37 = vsel %vm1430_vm1, %v1526_v1, 0.0  ;;  %v1181_v46 = vadd.f32 %v1180_v11, %v3752_v45  ;;  %v1527_v45 = vmul.f32 %v3908_v10, %v3908_v10 }
 0x18a   :  { %v1182_v26 = vpop.f32.mrf.mxu0  ;;  %v1365_v41 = vpop.f32.mrf.mxu1  ;;  %1577 = vadd.xlane.f32.xlu0 %v1576_v39  ;;  %v1580_v61 = vadd.f32 %v1579_v37, %v1525_v27 }
 0x18b   :  { %v1183_v22 = vadd.f32 %v1182_v26, %v3754_v48  ;;  %v1463_v32 = vsel %vm1430_vm1, %v3906_v19, 0.0  ;;  %v1528_v43 = vmul.f32 %v3906_v19, %v3906_v19  ;;  %v3932_v1 = vadd.f32 %v1365_v41, %v1181_v46 }
 0x18c   :  { %v1186_v54 = vpop.f32.mrf.mxu0  ;;  %v1367_v47 = vpop.f32.mrf.mxu1  ;;  %1461 = vadd.xlane.f32.xlu1 %v1460_v42  ;;  %v1464_v50 = vadd.f32 %v1463_v32, %v3908_v10 }
 0x18d   :  { %v3921_v36 = vadd.f32 %v1367_v47, %v1183_v22  ;;  %v1583_v48 = vsel %vm1430_vm1, %v1528_v43, 0.0  ;;  %v1187_v28 = vadd.f32 %v1186_v54, %v3756_v51  ;;  %v1529_v27 = vmul.f32 %v3932_v1, %v3932_v1 }
 0x18e   :  { %v1188_v4 = vpop.f32.mrf.mxu0  ;;  %v1371_v30 = vpop.f32.mrf.mxu1  ;;  %1465 = vadd.xlane.f32.xlu0 %v1464_v50  ;;  %v1584_v51 = vadd.f32 %v1583_v48, %v1527_v45 }
 0x18f   :  { %v1189_v33 = vadd.f32 %v1188_v4, %v3758_v53  ;;  %v1467_v13 = vsel %vm1430_vm1, %v3921_v36, 0.0  ;;  %v1530_v21 = vmul.f32 %v3921_v36, %v3921_v36  ;;  %v3936_v26 = vadd.f32 %v1371_v30, %v1187_v28 }
 0x190   :  { %v1192_v11 = vpop.f32.mrf.mxu0  ;;  %v1373_v7 = vpop.f32.mrf.mxu1  ;;  %1581 = vadd.xlane.f32.xlu1 %v1580_v61  ;;  %v1468_v53 = vadd.f32 %v1467_v13, %v3932_v1 }
 0x191   :  { %v3934_v39 = vadd.f32 %v1373_v7, %v1189_v33  ;;  %v1587_v41 = vsel %vm1430_vm1, %v1530_v21, 0.0  ;;  %v1193_v46 = vadd.f32 %v1192_v11, %v3760_v57  ;;  %v1531_v57 = vmul.f32 %v3936_v26, %v3936_v26 }
 0x192   :  { %v1194_v42 = vpop.f32.mrf.mxu0  ;;  %v1377_v22 = vpop.f32.mrf.mxu1  ;;  %1585 = vadd.xlane.f32.xlu0 %v1584_v51  ;;  %v1588_v61 = vadd.f32 %v1587_v41, %v1529_v27 }
 0x193   :  { %v1195_v32 = vadd.f32 %v1194_v42, %v3762_v60  ;;  %v1471_v37 = vsel %vm1430_vm1, %v3934_v39, 0.0  ;;  %v1532_v43 = vmul.f32 %v3934_v39, %v3934_v39  ;;  %v3960_v21 = vadd.f32 %v1377_v22, %v1193_v46 }
 0x194   :  { %v1198_v54 = vpop.f32.mrf.mxu0  ;;  %v1379_v47 = vpop.f32.mrf.mxu1  ;;  %1469 = vadd.xlane.f32.xlu1 %v1468_v53  ;;  %v1472_v50 = vadd.f32 %v1471_v37, %v3936_v26 }
 0x195   :  { %v3949_v48 = vadd.f32 %v1379_v47, %v1195_v32  ;;  %v1591_v60 = vsel %vm1430_vm1, %v1532_v43, 0.0  ;;  %v1199_v28 = vadd.f32 %v1198_v54, %v3764_v0  ;;  %v1533_v27 = vmul.f32 %v3960_v21, %v3960_v21 }
 0x196   :  { %v1200_v4 = vpop.f32.mrf.mxu0  ;;  %v1383_v30 = vpop.f32.mrf.mxu1  ;;  %1473 = vadd.xlane.f32.xlu0 %v1472_v50  ;;  %v1592_v0 = vadd.f32 %v1591_v60, %v1531_v57 }
 0x197   :  { %v1201_v45 = vadd.f32 %v1200_v4, %v3766_v24  ;;  %v1475_v33 = vsel %vm1430_vm1, %v3949_v48, 0.0  ;;  %v1534_v13 = vmul.f32 %v3949_v48, %v3949_v48  ;;  %v3964_v42 = vadd.f32 %v1383_v30, %v1199_v28 }
 0x198   :  { %v1204_v11 = vpop.f32.mrf.mxu0  ;;  %v1385_v7 = vpop.f32.mrf.mxu1  ;;  %1589 = vadd.xlane.f32.xlu1 %v1588_v61  ;;  %v1476_v24 = vadd.f32 %v1475_v33, %v3960_v21 }
 0x199   :  { %v3962_v51 = vadd.f32 %v1385_v7, %v1201_v45  ;;  %v1595_v22 = vsel %vm1430_vm1, %v1534_v13, 0.0  ;;  %v1205_v46 = vadd.f32 %v1204_v11, %v3768_v5  ;;  %v1535_v5 = vmul.f32 %v3964_v42, %v3964_v42 }
 0x19a   :  { %v1206_v53 = vpop.f32.mrf.mxu0  ;;  %v1389_v32 = vpop.f32.mrf.mxu1  ;;  %1593 = vadd.xlane.f32.xlu0 %v1592_v0  ;;  %v1596_v61 = vadd.f32 %v1595_v22, %v1533_v27 }
 0x19b   :  { %v1207_v37 = vadd.f32 %v1206_v53, %v3770_v9  ;;  %v1479_v41 = vsel %vm1430_vm1, %v3962_v51, 0.0  ;;  %v1536_v43 = vmul.f32 %v3962_v51, %v3962_v51  ;;  %v3988_v13 = vadd.f32 %v1389_v32, %v1205_v46 }
 0x19c   :  { %v1210_v54 = vpop.f32.mrf.mxu0  ;;  %v1391_v47 = vpop.f32.mrf.mxu1  ;;  %1477 = vadd.xlane.f32.xlu1 %v1476_v24  ;;  %v1480_v50 = vadd.f32 %v1479_v41, %v3964_v42 }
 0x19d   :  { %v3977_v60 = vadd.f32 %v1391_v47, %v1207_v37  ;;  %v1599_v9 = vsel %vm1430_vm1, %v1536_v43, 0.0  ;;  %v1211_v28 = vadd.f32 %v1210_v54, %v3772_v14  ;;  %4473 = vst [vmem:[#allocation6_spill] sm:$0xff] %v3988_v13  ;;  %v1537_v27 = vmul.f32 %v3988_v13, %v3988_v13 }
 0x19e   :  { %v1212_v4 = vpop.f32.mrf.mxu0  ;;  %v1395_v30 = vpop.f32.mrf.mxu1  ;;  %1481 = vadd.xlane.f32.xlu0 %v1480_v50  ;;  %v1600_v14 = vadd.f32 %v1599_v9, %v1535_v5 }
 0x19f   :  { %4472 = vst [vmem:[#allocation5_spill] sm:$0xff] %v3977_v60  ;;  %v1213_v57 = vadd.f32 %v1212_v4, %v3774_v18  ;;  %v1483_v45 = vsel %vm1430_vm1, %v3977_v60, 0.0  ;;  %v1538_v33 = vmul.f32 %v3977_v60, %v3977_v60  ;;  %v3992_v53 = vadd.f32 %v1395_v30, %v1211_v28 }
 0x1a0   :  { %v1216_v11 = vpop.f32.mrf.mxu0  ;;  %v1397_v7 = vpop.f32.mrf.mxu1  ;;  %1597 = vadd.xlane.f32.xlu1 %v1596_v61  ;;  %v1484_v18 = vadd.f32 %v1483_v45, %v3988_v13 }
 0x1a1   :  { %v3990_v0 = vadd.f32 %v1397_v7, %v1213_v57  ;;  %4475 = vst [vmem:[#allocation8_spill] sm:$0xff] %v3992_v53  ;;  %v1603_v32 = vsel %vm1430_vm1, %v1538_v33, 0.0  ;;  %v1217_v46 = vadd.f32 %v1216_v11, %v3776_v31  ;;  %v1539_v31 = vmul.f32 %v3992_v53, %v3992_v53 }
 0x1a2   :  { %v1218_v24 = vpop.f32.mrf.mxu0  ;;  %v1401_v37 = vpop.f32.mrf.mxu1  ;;  %1601 = vadd.xlane.f32.xlu0 %v1600_v14  ;;  %v1604_v61 = vadd.f32 %v1603_v32, %v1537_v27 }
 0x1a3   :  { %4474 = vst [vmem:[#allocation7_spill] sm:$0xff] %v3990_v0  ;;  %v1219_v41 = vadd.f32 %v1218_v24, %v3778_v35  ;;  %v1487_v22 = vsel %vm1430_vm1, %v3990_v0, 0.0  ;;  %v1540_v43 = vmul.f32 %v3990_v0, %v3990_v0  ;;  %v4016_v33 = vadd.f32 %v1401_v37, %v1217_v46 }
 0x1a4   :  { %v1222_v54 = vpop.f32.mrf.mxu0  ;;  %v1403_v47 = vpop.f32.mrf.mxu1  ;;  %1485 = vadd.xlane.f32.xlu1 %v1484_v18  ;;  %v1488_v50 = vadd.f32 %v1487_v22, %v3992_v53  ;;  %v1801_v53 = vld [vmem:[%s4439_s3 + $0x50] sm:$0xff] }
 0x1a5   :  { %v4005_v9 = vadd.f32 %v1403_v47, %v1219_v41  ;;  %v1607_v35 = vsel %vm1430_vm1, %v1540_v43, 0.0  ;;  %v1223_v28 = vadd.f32 %v1222_v54, %v3780_v40  ;;  %4477 = vst [vmem:[#allocation10_spill] sm:$0xff] %v4016_v33  ;;  %v1541_v27 = vmul.f32 %v4016_v33, %v4016_v33 }
 0x1a6   :  { %v1224_v4 = vpop.f32.mrf.mxu0  ;;  %v1407_v30 = vpop.f32.mrf.mxu1  ;;  %1489 = vadd.xlane.f32.xlu0 %v1488_v50  ;;  %v1608_v40 = vadd.f32 %v1607_v35, %v1539_v31 }
 0x1a7   :  { %4476 = vst [vmem:[#allocation9_spill] sm:$0xff] %v4005_v9  ;;  %v1225_v5 = vadd.f32 %v1224_v4, %v3782_v44  ;;  %v1491_v57 = vsel %vm1430_vm1, %v4005_v9, 0.0  ;;  %v1542_v45 = vmul.f32 %v4005_v9, %v4005_v9  ;;  %v4020_v24 = vadd.f32 %v1407_v30, %v1223_v28 }
 0x1a8   :  { %v1228_v11 = vpop.f32.mrf.mxu0  ;;  %v1409_v7 = vpop.f32.mrf.mxu1  ;;  %1605 = vadd.xlane.f32.xlu1 %v1604_v61  ;;  %v1492_v44 = vadd.f32 %v1491_v57, %v4016_v33 }
 0x1a9   :  { %v4018_v14 = vadd.f32 %v1409_v7, %v1225_v5  ;;  %4479 = vst [vmem:[#allocation12_spill] sm:$0xff] %v4020_v24  ;;  %v1611_v37 = vsel %vm1430_vm1, %v1542_v45, 0.0  ;;  %v1229_v46 = vadd.f32 %v1228_v11, %v3784_v49  ;;  %v1543_v49 = vmul.f32 %v4020_v24, %v4020_v24 }
 0x1aa   :  { %v1230_v18 = vpop.f32.mrf.mxu0  ;;  %v1413_v41 = vpop.f32.mrf.mxu1  ;;  %1609 = vadd.xlane.f32.xlu0 %v1608_v40  ;;  %v1612_v61 = vadd.f32 %v1611_v37, %v1541_v27  ;;  %v1972_v27 = vld [vmem:[%s4440_s4 + $0x8] sm:$0xff] }
 0x1ab   :  { %4478 = vst [vmem:[#allocation11_spill] sm:$0xff] %v4018_v14  ;;  %v1231_v22 = vadd.f32 %v1230_v18, %v3786_v52  ;;  %v1495_v32 = vsel %vm1430_vm1, %v4018_v14, 0.0  ;;  %v1544_v43 = vmul.f32 %v4018_v14, %v4018_v14  ;;  %v4044_v45 = vadd.f32 %v1413_v41, %v1229_v46 }
 0x1ac   :  { %v1234_v54 = vpop.f32.mrf.mxu0  ;;  %v1415_v47 = vpop.f32.mrf.mxu1  ;;  %1493 = vadd.xlane.f32.xlu1 %v1492_v44  ;;  %v1496_v50 = vadd.f32 %v1495_v32, %v4020_v24 }
 0x1ad   :  { %v4033_v35 = vadd.f32 %v1415_v47, %v1231_v22  ;;  %v1615_v52 = vsel %vm1430_vm1, %v1544_v43, 0.0  ;;  %v1235_v28 = vadd.f32 %v1234_v54, %v3788_v58  ;;  %4481 = vst [vmem:[#allocation14_spill] sm:$0xff] %v4044_v45  ;;  %v1545_v32 = vmul.f32 %v4044_v45, %v4044_v45  ;;  %v1973_v47 = vld [vmem:[%s4440_s4 + $0x10] sm:$0xff] }
 0x1ae   :  { %v1236_v4 = vpop.f32.mrf.mxu0  ;;  %v1419_v30 = vpop.f32.mrf.mxu1  ;;  %1497 = vadd.xlane.f32.xlu0 %v1496_v50  ;;  %v1616_v58 = vadd.f32 %v1615_v52, %v1543_v49  ;;  %v1975_v50 = vld [vmem:[%s4440_s4 + $0x20] sm:$0xff]  ;;  %v1977_v52 = vld [vmem:[%s4440_s4 + $0x30] sm:$0xff]  ;;  %v1978_v49 = vld [vmem:[%s4440_s4 + $0x38] sm:$0xff] }
 0x1af   :  { %4480 = vst [vmem:[#allocation13_spill] sm:$0xff] %v4033_v35  ;;  %v1237_v31 = vadd.f32 %v1236_v4, %v3790_v62  ;;  %v1499_v5 = vsel %vm1430_vm1, %v4033_v35, 0.0  ;;  %v1546_v57 = vmul.f32 %v4033_v35, %v4033_v35  ;;  %v4048_v40 = vadd.f32 %v1419_v30, %v1235_v28  ;;  %v1974_v28 = vld [vmem:[%s4440_s4 + $0x18] sm:$0xff]  ;;  %v1979_v4 = vld [vmem:[%s4440_s4 + $0x40] sm:$0xff]  ;;  %v1976_v30 = vld [vmem:[%s4440_s4 + $0x28] sm:$0xff] }
 0x1b0   :  { %v1421_v11 = vpop.f32.mrf.mxu1  ;;  %1613 = vadd.xlane.f32.xlu1 %v1612_v61  ;;  %v1500_v18 = vadd.f32 %v1499_v5, %v4044_v45  ;;  %v1981_v61 = vld [vmem:[%s4440_s4 + $0x50] sm:$0xff]  ;;  %v1980_v5 = vld [vmem:[%s4440_s4 + $0x48] sm:$0xff] }
 0x1b1   :  { %v4046_v7 = vadd.f32 %v1421_v11, %v1237_v31  ;;  %4483 = vst [vmem:[#allocation16_spill] sm:$0xff] %v4048_v40  ;;  %v1619_v44 = vsel %vm1430_vm1, %v1546_v57, 0.0  ;;  %v1547_v46 = vmul.f32 %v4048_v40, %v4048_v40  ;;  %v1983_v31 = vld [vmem:[%s4440_s4 + $0x60] sm:$0xff]  ;;  %v1982_v57 = vld [vmem:[%s4440_s4 + $0x58] sm:$0xff]  ;;  %v1984_v11 = vld [vmem:[%s4440_s4 + $0x68] sm:$0xff] }
 0x1b2   :  { %1617 = vadd.xlane.f32.xlu0 %v1616_v58  ;;  %v1620_v43 = vadd.f32 %v1619_v44, %v1545_v32  ;;  %v1986_v58 = vld [vmem:[%s4440_s4 + $0x78] sm:$0xff] }
 0x1b3   :  { %4482 = vst [vmem:[#allocation15_spill] sm:$0xff] %v4046_v7  ;;  %v1503_v62 = vsel %vm1430_vm1, %v4046_v7, 0.0  ;;  %v1548_v22 = vmul.f32 %v4046_v7, %v4046_v7  ;;  %v1793_v7 = vld [vmem:[%s4439_s3 + $0x10] sm:$0xff] }
 0x1b4   :  { %1501 = vadd.xlane.f32.xlu1 %v1500_v18  ;;  %v1504_v41 = vadd.f32 %v1503_v62, %v4048_v40  ;;  %v1240_v18 = vpop.f32.mrf.mxu0  ;;  %v1988_v62 = vld [vmem:[%s4440_s4 + $0x88] sm:$0xff] }
 0x1b5   :  { %v1623_v37 = vsel %vm1430_vm1, %v1548_v22, 0.0  ;;  %v1425_v22 = vpop.f32.mrf.mxu1 }
 0x1b6   :  { %1505 = vadd.xlane.f32.xlu0 %v1504_v41  ;;  %v1624_v54 = vadd.f32 %v1623_v37, %v1547_v46  ;;  %v1242_v44 = vpop.f32.mrf.mxu0 }
 0x1b7   :  { %v1243_v41 = vadd.f32 %v1242_v44, %v3794_v8  ;;  %v1427_v32 = vpop.f32.mrf.mxu1 }
 0x1b8   :  { %1621 = vadd.xlane.f32.xlu1 %v1620_v43 }
 0x1b9   :  { %v4108_v43 = vadd.f32 %v1427_v32, %v1243_v41 }
 0x1ba   :  { %1625 = vadd.xlane.f32.xlu0 %v1624_v54  ;;  %v1241_v54 = vadd.f32 %v1240_v18, %v3792_v2 }
 0x1bb   :  { %4484 = vst [vmem:[#allocation17_spill] sm:$0xff] %v4108_v43  ;;  %v1550_v8 = vmul.f32 %v4108_v43, %v4108_v43 }
 0x1c9   :  { %2003 = vperm.xlu1 %2212, %v1973_v47   ;;  %v4113_v47 = vpop.permute.xlu1 %1993 }
 0x1cd   :  { %2013 = vperm.xlu1 %2212, %v1975_v50  }
 0x1d0   :  { %1998 = vperm.xlu0 %2213, %v1972_v27  }
 0x1d1   :  { %2023 = vperm.xlu1 %2212, %v1977_v52  }
 0x1d4   :  { %2008 = vperm.xlu0 %2213, %v1974_v28   ;;  %v1507_v28 = vsel %vm1430_vm1, %v4108_v43, 0.0 }
 0x1d5   :  { %2033 = vperm.xlu1 %2212, %v1979_v4   ;;  %v4121_v4 = vadd.f32 %v1425_v22, %v1241_v54 }
 0x1d7   :  { %4485 = vst [vmem:[#allocation18_spill] sm:$0xff] %v4121_v4  ;;  %v1508_v2 = vadd.f32 %v1507_v28, %v4121_v4 }
 0x1d8   :  { %2018 = vperm.xlu0 %2213, %v1976_v30  }
 0x1d9   :  { %2043 = vperm.xlu1 %2212, %v1981_v61  }
 0x1dc   :  { %2028 = vperm.xlu0 %2213, %v1978_v49  }
 0x1dd   :  { %2053 = vperm.xlu1 %2212, %v1983_v31  }
 0x1e0   :  { %2038 = vperm.xlu0 %2213, %v1980_v5  }
 0x1e4   :  { %2048 = vperm.xlu0 %2213, %v1982_v57   ;;  %v1627_v57 = vsel %vm1430_vm1, %v1550_v8, 0.0 }
 0x1e8   :  { %2058 = vperm.xlu0 %2213, %v1984_v11  }
 0x1ec   :  { %2068 = vperm.xlu0 %2213, %v1986_v58   ;;  %v1549_v58 = vmul.f32 %v4121_v4, %v4121_v4 }
 0x1ee   :  { %v1628_v41 = vadd.f32 %v1627_v57, %v1549_v58 }
 0x1f0   :  { %2078 = vperm.xlu0 %2213, %v1988_v62  }
 0x1f7   :  { %v1434_v37 = vpop.xlane.xlu0 %1433 }
 0x1f8   :  { %v4110_v46 = vmul.f32 0.0051020407, %v1434_v37 }
 0x1fa   :  { %v1671_v27 = vmul.f32 %v4110_v46, %v4110_v46 }
 0x1fb   :  { %v1554_v50 = vpop.xlane.xlu0 %1553 }
 0x1fc   :  { %v1651_v52 = vmul.f32 0.0051020407, %v1554_v50 }
 0x1fd   :  { %v1558_v30 = vpop.xlane.xlu1 %1557 }
 0x1fe   :  { %v1691_v61 = vsub.f32 %v1651_v52, %v1671_v27  ;;  %v1652_v18 = vmul.f32 0.0051020407, %v1558_v30 }
 0x1ff   :  { %v1438_v49 = vpop.xlane.xlu0 %1437 }
 0x200   :  { %v1711_v31 = vadd.f32 1e-05, %v1691_v61  ;;  %v4124_v5 = vmul.f32 0.0051020407, %v1438_v49 }
 0x201   :  { %v1442_v11 = vpop.xlane.xlu1 %1441  ;;  %1509 = vadd.xlane.f32.xlu1 %v1508_v2 }
 0x202   :  { %2218 = vrsqrt.f32 %v1711_v31  ;;  %v1672_v62 = vmul.f32 %v4124_v5, %v4124_v5  ;;  %v4131_v44 = vmul.f32 0.0051020407, %v1442_v11 }
 0x203   :  { %v1562_v22 = vpop.xlane.xlu0 %1561 }
 0x204   :  { %v1692_v32 = vsub.f32 %v1652_v18, %v1672_v62  ;;  %v1673_v37 = vmul.f32 %v4131_v44, %v4131_v44  ;;  %v1653_v54 = vmul.f32 0.0051020407, %v1562_v22 }
 0x205   :  { %v1446_v50 = vpop.xlane.xlu1 %1445  ;;  %1629 = vadd.xlane.f32.xlu1 %v1628_v41  ;;  %v1791_v41 = vld [vmem:[%s4439_s3] sm:$0xff] }
 0x206   :  { %v4135_v27 = vmul.f32 0.0051020407, %v1446_v50  ;;  %v1712_v28 = vadd.f32 1e-05, %v1692_v32  ;;  %v1693_v8 = vsub.f32 %v1653_v54, %v1673_v37 }
 0x207   :  { %v1450_v52 = vpop.xlane.xlu0 %1449 }
 0x208   :  { %v4137_v61 = vmul.f32 0.0051020407, %v1450_v52  ;;  %v1674_v49 = vmul.f32 %v4135_v27, %v4135_v27  ;;  %2220 = vrsqrt.f32 %v1712_v28  ;;  %v1713_v57 = vadd.f32 1e-05, %v1693_v8 }
 0x209   :  { %v1566_v30 = vpop.xlane.xlu1 %1565 }
 0x20a   :  { %v1654_v2 = vmul.f32 0.0051020407, %v1566_v30  ;;  %v1675_v62 = vmul.f32 %v4137_v61, %v4137_v61  ;;  %2222 = vrsqrt.f32 %v1713_v57 }
 0x20b   :  { %v1570_v31 = vpop.xlane.xlu0 %1569 }
 0x20c   :  { %v1694_v11 = vsub.f32 %v1654_v2, %v1674_v49  ;;  %v1655_v58 = vmul.f32 0.0051020407, %v1570_v31  ;;  %v1985_v31 = vld [vmem:[%s4440_s4 + $0x70] sm:$0xff] }
 0x20d   :  { %v1454_v18 = vpop.xlane.xlu1 %1453 }
 0x20e   :  { %v4143_v22 = vmul.f32 0.0051020407, %v1454_v18  ;;  %v1714_v37 = vadd.f32 1e-05, %v1694_v11  ;;  %v1695_v50 = vsub.f32 %v1655_v58, %v1675_v62 }
 0x20f   :  { %v2219_v32 = vpop.eup %2218  ;;  %v1458_v54 = vpop.xlane.xlu0 %1457 }
 0x210   :  { %v1811_v28 = vmul.f32 %v2219_v32, %v1791_v41  ;;  %v4148_v8 = vmul.f32 0.0051020407, %v1458_v54  ;;  %v1676_v30 = vmul.f32 %v4143_v22, %v4143_v22  ;;  %2224 = vrsqrt.f32 %v1714_v37  ;;  %v1987_v37 = vld [vmem:[%s4440_s4 + $0x80] sm:$0xff] }
 0x211   :  { %v1574_v52 = vpop.xlane.xlu1 %1573  ;;  %v1715_v18 = vadd.f32 1e-05, %v1695_v50 }
 0x212   :  { %v1656_v49 = vmul.f32 0.0051020407, %v1574_v52  ;;  %1833 = vperm.xlu0 %2213, %v1811_v28   ;;  %v1677_v58 = vmul.f32 %v4148_v8, %v4148_v8 }
 0x213   :  { %v1578_v2 = vpop.xlane.xlu0 %1577  ;;  %2226 = vrsqrt.f32 %v1715_v18 }
 0x214   :  { %v1696_v11 = vsub.f32 %v1656_v49, %v1676_v30  ;;  %v1657_v43 = vmul.f32 0.0051020407, %v1578_v2  ;;  %v1792_v30 = vld [vmem:[%s4439_s3 + $0x8] sm:$0xff] }
 0x215   :  { %v1462_v57 = vpop.xlane.xlu1 %1461  ;;  %v2221_v52 = vpop.eup %2220 }
 0x216   :  { %v4157_v62 = vmul.f32 0.0051020407, %v1462_v57  ;;  %2063 = vperm.xlu1 %2212, %v1985_v31   ;;  %v1716_v41 = vadd.f32 1e-05, %v1696_v11  ;;  %v1697_v54 = vsub.f32 %v1657_v43, %v1677_v58  ;;  %v1812_v18 = vmul.f32 %v2221_v52, %v1792_v30  ;;  %v1794_v30 = vld [vmem:[%s4439_s3 + $0x18] sm:$0xff] }
 0x217   :  { %v1466_v32 = vpop.xlane.xlu0 %1465  ;;  %v2223_v43 = vpop.eup %2222 }
 0x218   :  { %v4162_v28 = vmul.f32 0.0051020407, %v1466_v32  ;;  %v1678_v49 = vmul.f32 %v4157_v62, %v4157_v62  ;;  %2228 = vrsqrt.f32 %v1716_v41  ;;  %v1717_v11 = vadd.f32 1e-05, %v1697_v54 }
 0x219   :  { %v1582_v50 = vpop.xlane.xlu1 %1581  ;;  %v1813_v52 = vmul.f32 %v2223_v43, %v1793_v7 }
 0x21a   :  { %v1658_v2 = vmul.f32 0.0051020407, %v1582_v50  ;;  %2073 = vperm.xlu1 %2212, %v1987_v37   ;;  %v1679_v58 = vmul.f32 %v4162_v28, %v4162_v28  ;;  %2230 = vrsqrt.f32 %v1717_v11 }
 0x21b   :  { %v1586_v31 = vpop.xlane.xlu0 %1585 }
 0x21c   :  { %v1698_v57 = vsub.f32 %v1658_v2, %v1678_v49  ;;  %v1659_v4 = vmul.f32 0.0051020407, %v1586_v31 }
 0x21d   :  { %v1470_v32 = vpop.xlane.xlu1 %1469  ;;  %v2225_v41 = vpop.eup %2224 }
 0x21e   :  { %v4174_v40 = vmul.f32 0.0051020407, %v1470_v32  ;;  %1838 = vperm.xlu1 %2212, %v1812_v18   ;;  %v1699_v50 = vsub.f32 %v1659_v4, %v1679_v58  ;;  %v1718_v54 = vadd.f32 1e-05, %v1698_v57  ;;  %v1814_v4 = vmul.f32 %v2225_v41, %v1794_v30  ;;  %v1796_v30 = vld [vmem:[%s4439_s3 + $0x28] sm:$0xff] }
 0x21f   :  { %v1474_v37 = vpop.xlane.xlu0 %1473 }
 0x220   :  { %v4176_v49 = vmul.f32 0.0051020407, %v1474_v37  ;;  %v1680_v31 = vmul.f32 %v4174_v40, %v4174_v40  ;;  %v1719_v32 = vadd.f32 1e-05, %v1699_v50  ;;  %2232 = vrsqrt.f32 %v1718_v54  ;;  %v2227_v7 = vpop.eup %2226  ;;  %v1795_v37 = vld [vmem:[%s4439_s3 + $0x20] sm:$0xff] }
 0x221   :  { %v1590_v2 = vpop.xlane.xlu1 %1589 }
 0x222   :  { %v1660_v35 = vmul.f32 0.0051020407, %v1590_v2  ;;  %1843 = vperm.xlu1 %2212, %v1813_v52   ;;  %v1681_v11 = vmul.f32 %v4176_v49, %v4176_v49  ;;  %2234 = vrsqrt.f32 %v1719_v32  ;;  %v1815_v52 = vmul.f32 %v2227_v7, %v1795_v37  ;;  %v1797_v7 = vld [vmem:[%s4439_s3 + $0x30] sm:$0xff] }
 0x223   :  { %v1594_v18 = vpop.xlane.xlu0 %1593 }
 0x224   :  { %v1700_v58 = vsub.f32 %v1660_v35, %v1680_v31  ;;  %v1661_v57 = vmul.f32 0.0051020407, %v1594_v18 }
 0x225   :  { %v1478_v43 = vpop.xlane.xlu1 %1477  ;;  %v2229_v41 = vpop.eup %2228 }
 0x226   :  { %v1720_v45 = vadd.f32 1e-05, %v1700_v58  ;;  %v1701_v14 = vsub.f32 %v1661_v57, %v1681_v11  ;;  %v4188_v24 = vmul.f32 0.0051020407, %v1478_v43  ;;  %1848 = vperm.xlu1 %2212, %v1814_v4   ;;  %v1816_v4 = vmul.f32 %v2229_v41, %v1796_v30 }
 0x227   :  { %v1482_v50 = vpop.xlane.xlu0 %1481  ;;  %v2231_v11 = vpop.eup %2230 }
 0x228   :  { %2236 = vrsqrt.f32 %v1720_v45  ;;  %v1721_v35 = vadd.f32 1e-05, %v1701_v14  ;;  %v4190_v54 = vmul.f32 0.0051020407, %v1482_v50  ;;  %v1682_v31 = vmul.f32 %v4188_v24, %v4188_v24 }
 0x229   :  { %v1598_v2 = vpop.xlane.xlu1 %1597  ;;  %v1817_v30 = vmul.f32 %v2231_v11, %v1797_v7 }
 0x22a   :  { %v1662_v18 = vmul.f32 0.0051020407, %v1598_v2  ;;  %1853 = vperm.xlu1 %2212, %v1815_v52   ;;  %2238 = vrsqrt.f32 %v1721_v35  ;;  %v1683_v14 = vmul.f32 %v4190_v54, %v4190_v54 }
 0x22b   :  { %v1602_v58 = vpop.xlane.xlu0 %1601 }
 0x22c   :  { %v1702_v32 = vsub.f32 %v1662_v18, %v1682_v31  ;;  %v1663_v45 = vmul.f32 0.0051020407, %v1602_v58  ;;  %v1798_v18 = vld [vmem:[%s4439_s3 + $0x38] sm:$0xff] }
 0x22d   :  { %v1486_v57 = vpop.xlane.xlu1 %1485  ;;  %v2233_v2 = vpop.eup %2232 }
 0x22e   :  { %v1722_v43 = vadd.f32 1e-05, %v1702_v32  ;;  %v1703_v37 = vsub.f32 %v1663_v45, %v1683_v14  ;;  %v4202_v50 = vmul.f32 0.0051020407, %v1486_v57  ;;  %1858 = vperm.xlu1 %2212, %v1816_v4   ;;  %v1800_v4 = vld [vmem:[%s4439_s3 + $0x48] sm:$0xff] }
 0x22f   :  { %v1490_v52 = vpop.xlane.xlu0 %1489  ;;  %v2235_v45 = vpop.eup %2234 }
 0x230   :  { %4486 = vst [vmem:[#allocation19_spill] sm:$0xff] %v4202_v50  ;;  %2240 = vrsqrt.f32 %v1722_v43  ;;  %v1723_v41 = vadd.f32 1e-05, %v1703_v37  ;;  %v4204_v35 = vmul.f32 0.0051020407, %v1490_v52  ;;  %v1684_v58 = vmul.f32 %v4202_v50, %v4202_v50 }
 0x231   :  { %v1606_v31 = vpop.xlane.xlu1 %1605  ;;  %v1818_v43 = vmul.f32 %v2233_v2, %v1798_v18 }
 0x232   :  { %4487 = vst [vmem:[#allocation20_spill] sm:$0xff] %v4204_v35  ;;  %2242 = vrsqrt.f32 %v1723_v41  ;;  %v1664_v32 = vmul.f32 0.0051020407, %v1606_v31  ;;  %1863 = vperm.xlu1 %2212, %v1817_v30   ;;  %v1685_v11 = vmul.f32 %v4204_v35, %v4204_v35  ;;  %v1799_v41 = vld [vmem:[%s4439_s3 + $0x40] sm:$0xff] }
 0x233   :  { %v1610_v14 = vpop.xlane.xlu0 %1609 }
 0x234   :  { %v1704_v57 = vsub.f32 %v1664_v32, %v1684_v58  ;;  %v1665_v7 = vmul.f32 0.0051020407, %v1610_v14  ;;  %v1819_v14 = vmul.f32 %v2235_v45, %v1799_v41 }
 0x235   :  { %v2237_v37 = vpop.eup %2236  ;;  %v1494_v52 = vpop.xlane.xlu1 %1493 }
 0x236   :  { %v1724_v31 = vadd.f32 1e-05, %v1704_v57  ;;  %v1705_v30 = vsub.f32 %v1665_v7, %v1685_v11  ;;  %v4219_v9 = vmul.f32 0.0051020407, %v1494_v52  ;;  %1868 = vperm.xlu1 %2212, %v1818_v43   ;;  %v1820_v33 = vmul.f32 %v2237_v37, %v1800_v4 }
 0x237   :  { %v1498_v0 = vpop.xlane.xlu0 %1497  ;;  %v2239_v2 = vpop.eup %2238 }
 0x238   :  { %4488 = vst [vmem:[#allocation21_spill] sm:$0xff] %v4219_v9  ;;  %2244 = vrsqrt.f32 %v1724_v31  ;;  %v1725_v58 = vadd.f32 1e-05, %v1705_v30  ;;  %v4221_v32 = vmul.f32 0.0051020407, %v1498_v0  ;;  %1878 = vperm.xlu0 %2213, %v1820_v33   ;;  %v1686_v57 = vmul.f32 %v4219_v9, %v4219_v9  ;;  %v1802_v0 = vld [vmem:[%s4439_s3 + $0x58] sm:$0xff] }
 0x239   :  { %v1614_v18 = vpop.xlane.xlu1 %1613  ;;  %v1821_v43 = vmul.f32 %v2239_v2, %v1801_v53 }
 0x23a   :  { %4489 = vst [vmem:[#allocation22_spill] sm:$0xff] %v4221_v32  ;;  %2246 = vrsqrt.f32 %v1725_v58  ;;  %v1666_v11 = vmul.f32 0.0051020407, %v1614_v18  ;;  %1873 = vperm.xlu1 %2212, %v1819_v14   ;;  %v1687_v33 = vmul.f32 %v4221_v32, %v4221_v32  ;;  %v1803_v14 = vld [vmem:[%s4439_s3 + $0x60] sm:$0xff] }
 0x23b   :  { %v1618_v4 = vpop.xlane.xlu0 %1617 }
 0x23c   :  { %v1706_v7 = vsub.f32 %v1666_v11, %v1686_v57  ;;  %v1667_v45 = vmul.f32 0.0051020407, %v1618_v4 }
 0x23d   :  { %v2241_v37 = vpop.eup %2240  ;;  %v1502_v52 = vpop.xlane.xlu1 %1501 }
 0x23e   :  { %v1726_v41 = vadd.f32 1e-05, %v1706_v7  ;;  %v1707_v31 = vsub.f32 %v1667_v45, %v1687_v33  ;;  %v4233_v30 = vmul.f32 0.0051020407, %v1502_v52  ;;  %1883 = vperm.xlu1 %2212, %v1821_v43   ;;  %v1822_v58 = vmul.f32 %v2241_v37, %v1802_v0  ;;  %v1804_v33 = vld [vmem:[%s4439_s3 + $0x68] sm:$0xff]  ;;  %v1805_v52 = vld [vmem:[%s4439_s3 + $0x70] sm:$0xff] }
 0x23f   :  { %v2243_v18 = vpop.eup %2242  ;;  %v1506_v9 = vpop.xlane.xlu0 %1505 }
 0x240   :  { %4490 = vst [vmem:[#allocation23_spill] sm:$0xff] %v4233_v30  ;;  %2248 = vrsqrt.f32 %v1726_v41  ;;  %v1727_v57 = vadd.f32 1e-05, %v1707_v31  ;;  %v4238_v11 = vmul.f32 0.0051020407, %v1506_v9  ;;  %1888 = vperm.xlu0 %2213, %v1822_v58   ;;  %v1823_v2 = vmul.f32 %v2243_v18, %v1803_v14 }
 0x241   :  { %v1622_v53 = vpop.xlane.xlu1 %1621  ;;  %v1688_v4 = vmul.f32 %v4233_v30, %v4233_v30  ;;  %v1752_v30 = vsub.f32 %v3798_v34, %v4110_v46 }
 0x242   :  { %4491 = vst [vmem:[#allocation24_spill] sm:$0xff] %v4238_v11  ;;  %2250 = vrsqrt.f32 %v1727_v57  ;;  %v1668_v7 = vmul.f32 0.0051020407, %v1622_v53  ;;  %1893 = vperm.xlu1 %2212, %v1823_v2   ;;  %v1689_v43 = vmul.f32 %v4238_v11, %v4238_v11  ;;  %v1806_v53 = vld [vmem:[%s4439_s3 + $0x78] sm:$0xff]  ;;  %v1751_v11 = vsub.f32 %v3801_v38, %v4110_v46 }
 0x243   :  { %v1626_v0 = vpop.xlane.xlu0 %1625  ;;  %v1753_v46 = vsub.f32 %v3808_v56, %v4124_v5 }
 0x244   :  { %v1708_v45 = vsub.f32 %v1668_v7, %v1688_v4  ;;  %v1669_v9 = vmul.f32 0.0051020407, %v1626_v0  ;;  %v1807_v4 = vld [vmem:[%s4439_s3 + $0x80] sm:$0xff] }
 0x245   :  { %v2245_v37 = vpop.eup %2244 }
 0x246   :  { %v1728_v41 = vadd.f32 1e-05, %v1708_v45  ;;  %v1709_v31 = vsub.f32 %v1669_v9, %v1689_v43  ;;  %v1824_v58 = vmul.f32 %v2245_v37, %v1804_v33  ;;  %v1808_v45 = vld [vmem:[%s4439_s3 + $0x88] sm:$0xff]  ;;  %v1809_v9 = vld [vmem:[%s4439_s3 + $0x90] sm:$0xff] }
 0x247   :  { %v2247_v14 = vpop.eup %2246 }
 0x248   :  { %2252 = vrsqrt.f32 %v1728_v41  ;;  %v1729_v18 = vadd.f32 1e-05, %v1709_v31  ;;  %1898 = vperm.xlu0 %2213, %v1824_v58   ;;  %v1825_v57 = vmul.f32 %v2247_v14, %v1805_v52  ;;  %v1989_v58 = vld [vmem:[%s4440_s4 + $0x90] sm:$0xff] }
 0x24a   :  { %2254 = vrsqrt.f32 %v1729_v18  ;;  %1903 = vperm.xlu1 %2212, %v1825_v57   ;;  %v2004_v57 = vpop.permute.xlu1 %2003 }
 0x24b   :  { %v1999_v31 = vpop.permute.xlu0 %1998 }
 0x24d   :  { %v2249_v2 = vpop.eup %2248 }
 0x24e   :  { %v1826_v7 = vmul.f32 %v2249_v2, %v1806_v53  ;;  %v4269_v2 = vpop.permute.xlu1 %2013 }
 0x24f   :  { %v2251_v0 = vpop.eup %2250  ;;  %v2009_v14 = vpop.permute.xlu0 %2008 }
 0x250   :  { %1908 = vperm.xlu0 %2213, %v1826_v7   ;;  %v1827_v33 = vmul.f32 %v2251_v0, %v1807_v4 }
 0x252   :  { %1913 = vperm.xlu1 %2212, %v1827_v33   ;;  %v4273_v7 = vpop.permute.xlu1 %2023 }
 0x253   :  { %v4265_v18 = vpop.permute.xlu0 %2018 }
 0x255   :  { %v2253_v43 = vpop.eup %2252 }
 0x256   :  { %v1828_v37 = vmul.f32 %v2253_v43, %v1808_v45  ;;  %v4277_v33 = vpop.permute.xlu1 %2033 }
 0x257   :  { %v2255_v52 = vpop.eup %2254  ;;  %v4267_v53 = vpop.permute.xlu0 %2028 }
 0x258   :  { %1918 = vperm.xlu0 %2213, %v1828_v37   ;;  %v1829_v41 = vmul.f32 %v2255_v52, %v1809_v9 }
 0x25a   :  { %1923 = vperm.xlu1 %2212, %v1829_v41   ;;  %v4281_v43 = vpop.permute.xlu1 %2043 }
 0x25b   :  { %v4271_v4 = vpop.permute.xlu0 %2038 }
 0x25e   :  { %2083 = vperm.xlu1 %2212, %v1989_v58   ;;  %v4285_v37 = vpop.permute.xlu1 %2053 }
 0x25f   :  { %v4275_v0 = vpop.permute.xlu0 %2048  ;;  %4494 = vst [vmem:[#allocation27_spill] sm:$0xff] %v4285_v37 }
 0x263   :  { %v4279_v45 = vpop.permute.xlu0 %2058 }
 0x264   :  { %4492 = vst [vmem:[#allocation25_spill] sm:$0xff] %v4279_v45 }
 0x267   :  { %v4283_v9 = vpop.permute.xlu0 %2068 }
 0x268   :  { %4493 = vst [vmem:[#allocation26_spill] sm:$0xff] %v4283_v9 }
 0x26b   :  { %v4287_v52 = vpop.permute.xlu0 %2078 }
 0x26c   :  { %4495 = vst [vmem:[#allocation28_spill] sm:$0xff] %v4287_v52 }
 0x28a   :  { %v1510_v41 = vpop.xlane.xlu1 %1509 }
 0x28b   :  { %v4289_v58 = vmul.f32 0.0051020407, %v1510_v41 }
 0x28d   :  { %v1834_v32 = vpop.permute.xlu0 %1833  ;;  %v1690_v9 = vmul.f32 %v4289_v58, %v4289_v58 }
 0x28e   :  { %v1630_v35 = vpop.xlane.xlu1 %1629  ;;  %v1931_v45 = vmul.f32 %v1834_v32, %v1751_v11  ;;  %v1932_v60 = vmul.f32 %v1834_v32, %v1752_v30 }
 0x28f   :  { %v1670_v13 = vmul.f32 0.0051020407, %v1630_v35  ;;  %v1754_v35 = vsub.f32 %v3811_v55, %v4124_v5  ;;  %v1810_v55 = vld [vmem:[%s4439_s3 + $0x98] sm:$0xff] }
 0x290   :  { %v2091_v50 = vadd.f32 %v4113_v47, %v1931_v45  ;;  %v2092_v52 = vadd.f32 %v4113_v47, %v1932_v60  ;;  %v1755_v47 = vsub.f32 %v3827_v25, %v4131_v44  ;;  %v1758_v25 = vsub.f32 %v3836_v29, %v4135_v27  ;;  %v1990_v29 = vld [vmem:[%s4440_s4 + $0x98] sm:$0xff]  ;;  %s2281_s4 = smov [#allocation2]  }
 0x291   :  { %v1710_v41 = vsub.f32 %v1670_v13, %v1690_v9  ;;  %s2176_s10 = sshll.u32 %s2281_s4, 4  ;;  %s2177_s10 = int_to_ptr.vmem [resolvable:$true] %s2176_s10 }
 0x292   :  { %v4299_v37 = vpop.permute.xlu1 %2063  ;;  %2131 = vst [vmem:[#allocation2] sm:$0xff] %v2091_v50  ;;  %2132 = vst.msk [vmem:[#allocation2 + $0x8] sm:$0xff] %vm1430_vm1, %v2092_v52  ;;  %v1756_v50 = vsub.f32 %v3822_v17, %v4131_v44  ;;  %s2258_s11 = scalar_lea.vmem %s2177_s10, 5120  ;;  %p2263_p1 = scmp.lt.s32.totalorder %s2177_s10, %s2177_s10 }
 0x293   :  { %v1730_v38 = vadd.f32 1e-05, %v1710_v41  ;;  %p2259_p0 = scmp.ne.s32.totalorder %s2177_s10, %s2258_s11  ;;  %p2264_p2 = scmp.lt.s32.totalorder %s2258_s11, %s2258_s11 }
 0x295   :  { %2256 = vrsqrt.f32 %v1730_v38  ;;  %p2265_p3 = por %p2264_p2, %p2263_p1 }
 0x296   :  { %v4302_v34 = vpop.permute.xlu1 %2073 }
 0x297   :  { %p2266_p4 = pnand %p2265_p3, %p2259_p0 }
 0x29a   :  { %v1839_v32 = vpop.permute.xlu1 %1838 }
 0x29b   :  { %v1933_v30 = vmul.f32 %v1839_v32, %v1753_v46  ;;  %v1934_v11 = vmul.f32 %v1839_v32, %v1754_v35 }
 0x29d   :  { %v2093_v60 = vadd.f32 %v1999_v31, %v1933_v30  ;;  %v2094_v13 = vadd.f32 %v1999_v31, %v1934_v11  ;;  %v1757_v31 = vsub.f32 %v3848_v6, %v4135_v27  ;;  %v1760_v6 = vsub.f32 %v3850_v15, %v4137_v61 }
 0x29e   :  { %v1844_v45 = vpop.permute.xlu1 %1843  ;;  %v1762_v15 = vsub.f32 %v3865_v59, %v4143_v22 }
 0x29f   :  { %2133 = vst [vmem:[#allocation2 + $0x10] sm:$0xff] %v2093_v60  ;;  %2134 = vst.msk [vmem:[#allocation2 + $0x18] sm:$0xff] %vm1430_vm1, %v2094_v13  ;;  %v1935_v9 = vmul.f32 %v1844_v45, %v1755_v47  ;;  %v1936_v56 = vmul.f32 %v1844_v45, %v1756_v50 }
 0x2a1   :  { %v2095_v5 = vadd.f32 %v2004_v57, %v1935_v9  ;;  %v2096_v52 = vadd.f32 %v2004_v57, %v1936_v56  ;;  %v1759_v57 = vsub.f32 %v3852_v63, %v4137_v61  ;;  %v1761_v63 = vsub.f32 %v3876_v3, %v4143_v22 }
 0x2a2   :  { %v2257_v41 = vpop.eup %2256  ;;  %v1849_v17 = vpop.permute.xlu1 %1848  ;;  %v1764_v9 = vsub.f32 %v3878_v12, %v4148_v8  ;;  %v1769_v12 = vsub.f32 %v3932_v1, %v4174_v40  ;;  %v1768_v1 = vsub.f32 %v3906_v19, %v4162_v28  ;;  %v1771_v19 = vsub.f32 %v3936_v26, %v4176_v49 }
 0x2a3   :  { %2135 = vst [vmem:[#allocation2 + $0x20] sm:$0xff] %v2095_v5  ;;  %2136 = vst.msk [vmem:[#allocation2 + $0x28] sm:$0xff] %vm1430_vm1, %v2096_v52  ;;  %v1937_v44 = vmul.f32 %v1849_v17, %v1757_v31  ;;  %v1938_v38 = vmul.f32 %v1849_v17, %v1758_v25  ;;  %v1830_v46 = vmul.f32 %v2257_v41, %v1810_v55 }
 0x2a4   :  { %v1765_v5 = vsub.f32 %v3904_v23, %v4157_v62 }
 0x2a5   :  { %v2097_v35 = vadd.f32 %v2009_v14, %v1937_v44  ;;  %v2098_v32 = vadd.f32 %v2009_v14, %v1938_v38  ;;  %1928 = vperm.xlu0 %2213, %v1830_v46   ;;  %v1773_v46 = vsub.f32 %v3960_v21, %v4188_v24  ;;  %v1776_v21 = vsub.f32 %v3962_v51, %v4190_v54 }
 0x2a6   :  { %v1854_v30 = vpop.permute.xlu1 %1853 }
 0x2a7   :  { %2137 = vst [vmem:[#allocation2 + $0x30] sm:$0xff] %v2097_v35  ;;  %2138 = vst.msk [vmem:[#allocation2 + $0x38] sm:$0xff] %vm1430_vm1, %v2098_v32  ;;  %v1939_v27 = vmul.f32 %v1854_v30, %v1759_v57  ;;  %v1940_v11 = vmul.f32 %v1854_v30, %v1760_v6  ;;  %v1774_v35 = vsub.f32 %v3949_v48, %v4188_v24 }
 0x2a9   :  { %v2099_v60 = vadd.f32 %v4269_v2, %v1939_v27  ;;  %v2100_v14 = vadd.f32 %v4269_v2, %v1940_v11  ;;  %2088 = vperm.xlu0 %2213, %v1990_v29   ;;  %v1763_v2 = vsub.f32 %v3880_v20, %v4148_v8  ;;  %v1770_v8 = vsub.f32 %v3921_v36, %v4174_v40 }
 0x2aa   :  { %v1859_v61 = vpop.permute.xlu1 %1858 }
 0x2ab   :  { %2139 = vst [vmem:[#allocation2 + $0x40] sm:$0xff] %v2099_v60  ;;  %2140 = vst.msk [vmem:[#allocation2 + $0x48] sm:$0xff] %vm1430_vm1, %v2100_v14  ;;  %v1941_v13 = vmul.f32 %v1859_v61, %v1761_v63  ;;  %v1942_v47 = vmul.f32 %v1859_v61, %v1762_v15  ;;  %v4497_v14 = vld [vmem:[#allocation19_spill] sm:$0xff]  ;;  %v4498_v63 = vld [vmem:[#allocation6_spill] sm:$0xff] }
 0x2ac   :  { %v1777_v51 = vsub.f32 %v4498_v63, %v4497_v14 }
 0x2ad   :  { %v2101_v50 = vadd.f32 %v4265_v18, %v1941_v13  ;;  %v2102_v45 = vadd.f32 %v4265_v18, %v1942_v47  ;;  %v1766_v18 = vsub.f32 %v3893_v16, %v4157_v62  ;;  %v1767_v16 = vsub.f32 %v3908_v10, %v4162_v28  ;;  %v4500_v47 = vld [vmem:[#allocation20_spill] sm:$0xff] }
 0x2ae   :  { %v1864_v3 = vpop.permute.xlu1 %1863  ;;  %v1772_v28 = vsub.f32 %v3934_v39, %v4176_v49  ;;  %v1775_v39 = vsub.f32 %v3964_v42, %v4190_v54  ;;  %v4499_v54 = vld [vmem:[#allocation5_spill] sm:$0xff] }
 0x2af   :  { %2141 = vst [vmem:[#allocation2 + $0x50] sm:$0xff] %v2101_v50  ;;  %2142 = vst.msk [vmem:[#allocation2 + $0x58] sm:$0xff] %vm1430_vm1, %v2102_v45  ;;  %v1943_v59 = vmul.f32 %v1864_v3, %v1763_v2  ;;  %v1944_v22 = vmul.f32 %v1864_v3, %v1764_v9  ;;  %v1778_v15 = vsub.f32 %v4499_v54, %v4497_v14  ;;  %v4501_v50 = vld [vmem:[#allocation8_spill] sm:$0xff]  ;;  %v4502_v2 = vld [vmem:[#allocation7_spill] sm:$0xff] }
 0x2b0   :  { %v1779_v45 = vsub.f32 %v4501_v50, %v4500_v47  ;;  %v1780_v9 = vsub.f32 %v4502_v2, %v4500_v47 }
 0x2b1   :  { %v2103_v56 = vadd.f32 %v4273_v7, %v1943_v59  ;;  %v2104_v55 = vadd.f32 %v4273_v7, %v1944_v22  ;;  %v4503_v59 = vld [vmem:[#allocation25_spill] sm:$0xff] }
 0x2b2   :  { %v1869_v20 = vpop.permute.xlu1 %1868 }
 0x2b3   :  { %2143 = vst [vmem:[#allocation2 + $0x60] sm:$0xff] %v2103_v56  ;;  %2144 = vst.msk [vmem:[#allocation2 + $0x68] sm:$0xff] %vm1430_vm1, %v2104_v55  ;;  %v1945_v52 = vmul.f32 %v1869_v20, %v1765_v5  ;;  %v1946_v31 = vmul.f32 %v1869_v20, %v1766_v18  ;;  %v1879_v25 = vpop.permute.xlu0 %1878 }
 0x2b4   :  { %v1949_v7 = vmul.f32 %v1879_v25, %v1769_v12  ;;  %v1950_v41 = vmul.f32 %v1879_v25, %v1770_v8  ;;  %v4504_v12 = vld [vmem:[#allocation21_spill] sm:$0xff]  ;;  %v4505_v8 = vld [vmem:[#allocation10_spill] sm:$0xff] }
 0x2b5   :  { %v2105_v23 = vadd.f32 %v4267_v53, %v1945_v52  ;;  %v2106_v17 = vadd.f32 %v4267_v53, %v1946_v31  ;;  %v1781_v52 = vsub.f32 %v4505_v8, %v4504_v12  ;;  %v4506_v31 = vld [vmem:[#allocation9_spill] sm:$0xff] }
 0x2b6   :  { %v2109_v36 = vadd.f32 %v4271_v4, %v1949_v7  ;;  %v2110_v40 = vadd.f32 %v4271_v4, %v1950_v41  ;;  %v1874_v62 = vpop.permute.xlu1 %1873  ;;  %v1782_v25 = vsub.f32 %v4506_v31, %v4504_v12 }
 0x2b7   :  { %2145 = vst [vmem:[#allocation2 + $0x70] sm:$0xff] %v2105_v23  ;;  %2146 = vst.msk [vmem:[#allocation2 + $0x78] sm:$0xff] %vm1430_vm1, %v2106_v17  ;;  %v1947_v44 = vmul.f32 %v1874_v62, %v1767_v16  ;;  %v1948_v38 = vmul.f32 %v1874_v62, %v1768_v1  ;;  %v4507_v17 = vld [vmem:[#allocation22_spill] sm:$0xff]  ;;  %v4508_v16 = vld [vmem:[#allocation12_spill] sm:$0xff] }
 0x2b8   :  { %2149 = vst [vmem:[#allocation2 + $0x90] sm:$0xff] %v2109_v36  ;;  %2150 = vst.msk [vmem:[#allocation2 + $0x98] sm:$0xff] %vm1430_vm1, %v2110_v40  ;;  %v1783_v1 = vsub.f32 %v4508_v16, %v4507_v17  ;;  %v4509_v36 = vld [vmem:[#allocation11_spill] sm:$0xff] }
 0x2b9   :  { %v2107_v53 = vadd.f32 %v4277_v33, %v1947_v44  ;;  %v2108_v10 = vadd.f32 %v4277_v33, %v1948_v38  ;;  %v1784_v40 = vsub.f32 %v4509_v36, %v4507_v17 }
 0x2ba   :  { %v1884_v4 = vpop.permute.xlu1 %1883 }
 0x2bb   :  { %2147 = vst [vmem:[#allocation2 + $0x80] sm:$0xff] %v2107_v53  ;;  %2148 = vst.msk [vmem:[#allocation2 + $0x88] sm:$0xff] %vm1430_vm1, %v2108_v10  ;;  %v1951_v32 = vmul.f32 %v1884_v4, %v1771_v19  ;;  %v1952_v57 = vmul.f32 %v1884_v4, %v1772_v28  ;;  %v1889_v6 = vpop.permute.xlu0 %1888  ;;  %v4511_v4 = vld [vmem:[#allocation23_spill] sm:$0xff] }
 0x2bc   :  { %v1953_v33 = vmul.f32 %v1889_v6, %v1773_v46  ;;  %v1954_v30 = vmul.f32 %v1889_v6, %v1774_v35  ;;  %v4512_v46 = vld [vmem:[#allocation14_spill] sm:$0xff] }
 0x2bd   :  { %v2111_v26 = vadd.f32 %v4281_v43, %v1951_v32  ;;  %v2112_v29 = vadd.f32 %v4281_v43, %v1952_v57  ;;  %v4496_v43 = vld [vmem:[#allocation27_spill] sm:$0xff]  ;;  %v1785_v35 = vsub.f32 %v4512_v46, %v4511_v4  ;;  %v4513_v32 = vld [vmem:[#allocation13_spill] sm:$0xff] }
 0x2be   :  { %v2113_v48 = vadd.f32 %v4275_v0, %v1953_v33  ;;  %v2114_v24 = vadd.f32 %v4275_v0, %v1954_v30  ;;  %v1894_v49 = vpop.permute.xlu1 %1893  ;;  %v1786_v57 = vsub.f32 %v4513_v32, %v4511_v4 }
 0x2bf   :  { %2151 = vst [vmem:[#allocation2 + $0xa0] sm:$0xff] %v2111_v26  ;;  %2152 = vst.msk [vmem:[#allocation2 + $0xa8] sm:$0xff] %vm1430_vm1, %v2112_v29  ;;  %v1955_v27 = vmul.f32 %v1894_v49, %v1775_v39  ;;  %v1956_v11 = vmul.f32 %v1894_v49, %v1776_v21  ;;  %v4514_v29 = vld [vmem:[#allocation28_spill] sm:$0xff]  ;;  %v4517_v49 = vld [vmem:[#allocation15_spill] sm:$0xff] }
 0x2c0   :  { %2153 = vst [vmem:[#allocation2 + $0xb0] sm:$0xff] %v2113_v48  ;;  %2154 = vst.msk [vmem:[#allocation2 + $0xb8] sm:$0xff] %vm1430_vm1, %v2114_v24  ;;  %v4515_v48 = vld [vmem:[#allocation24_spill] sm:$0xff] }
 0x2c1   :  { %v2115_v60 = vadd.f32 %v4496_v43, %v1955_v27  ;;  %v2116_v42 = vadd.f32 %v4496_v43, %v1956_v11  ;;  %v4516_v24 = vld [vmem:[#allocation16_spill] sm:$0xff]  ;;  %v1788_v27 = vsub.f32 %v4517_v49, %v4515_v48 }
 0x2c3   :  { %2155 = vst [vmem:[#allocation2 + $0xc0] sm:$0xff] %v2115_v60  ;;  %2156 = vst.msk [vmem:[#allocation2 + $0xc8] sm:$0xff] %vm1430_vm1, %v2116_v42  ;;  %v1899_v0 = vpop.permute.xlu0 %1898 }
 0x2c4   :  { %v1957_v61 = vmul.f32 %v1899_v0, %v1777_v51  ;;  %v1958_v13 = vmul.f32 %v1899_v0, %v1778_v15  ;;  %v4518_v51 = vld [vmem:[#allocation18_spill] sm:$0xff]  ;;  %v4519_v15 = vld [vmem:[#allocation17_spill] sm:$0xff] }
 0x2c5   :  { %v1904_v3 = vpop.permute.xlu1 %1903  ;;  %v1789_v54 = vsub.f32 %v4518_v51, %v4289_v58  ;;  %v1790_v0 = vsub.f32 %v4519_v15, %v4289_v58 }
 0x2c6   :  { %v2117_v22 = vadd.f32 %v4503_v59, %v1957_v61  ;;  %v2118_v56 = vadd.f32 %v4503_v59, %v1958_v13  ;;  %v1959_v55 = vmul.f32 %v1904_v3, %v1779_v45  ;;  %v1960_v5 = vmul.f32 %v1904_v3, %v1780_v9 }
 0x2c8   :  { %2157 = vst [vmem:[#allocation2 + $0xd0] sm:$0xff] %v2117_v22  ;;  %2158 = vst.msk [vmem:[#allocation2 + $0xd8] sm:$0xff] %vm1430_vm1, %v2118_v56  ;;  %v2119_v18 = vadd.f32 %v4299_v37, %v1959_v55  ;;  %v2120_v20 = vadd.f32 %v4299_v37, %v1960_v5  ;;  %v4510_v37 = vld [vmem:[#allocation26_spill] sm:$0xff] }
 0x2ca   :  { %2159 = vst [vmem:[#allocation2 + $0xe0] sm:$0xff] %v2119_v18  ;;  %2160 = vst.msk [vmem:[#allocation2 + $0xe8] sm:$0xff] %vm1430_vm1, %v2120_v20 }
 0x2cb   :  { %v1909_v7 = vpop.permute.xlu0 %1908 }
 0x2cc   :  { %v1961_v41 = vmul.f32 %v1909_v7, %v1781_v52  ;;  %v1962_v23 = vmul.f32 %v1909_v7, %v1782_v25 }
 0x2cd   :  { %v1914_v62 = vpop.permute.xlu1 %1913 }
 0x2ce   :  { %v2121_v44 = vadd.f32 %v4510_v37, %v1961_v41  ;;  %v2122_v38 = vadd.f32 %v4510_v37, %v1962_v23  ;;  %v1963_v53 = vmul.f32 %v1914_v62, %v1783_v1  ;;  %v1964_v10 = vmul.f32 %v1914_v62, %v1784_v40 }
 0x2d0   :  { %2161 = vst [vmem:[#allocation2 + $0xf0] sm:$0xff] %v2121_v44  ;;  %2162 = vst.msk [vmem:[#allocation2 + $0xf8] sm:$0xff] %vm1430_vm1, %v2122_v38  ;;  %v2123_v19 = vadd.f32 %v4302_v34, %v1963_v53  ;;  %v2124_v28 = vadd.f32 %v4302_v34, %v1964_v10  ;;  %v1787_v34 = vsub.f32 %v4516_v24, %v4515_v48 }
 0x2d2   :  { %2163 = vst [vmem:[#allocation2 + $0x100] sm:$0xff] %v2123_v19  ;;  %2164 = vst.msk [vmem:[#allocation2 + $0x108] sm:$0xff] %vm1430_vm1, %v2124_v28 }
 0x2d3   :  { %v1919_v6 = vpop.permute.xlu0 %1918 }
 0x2d4   :  { %v1965_v33 = vmul.f32 %v1919_v6, %v1785_v35  ;;  %v1966_v30 = vmul.f32 %v1919_v6, %v1786_v57 }
 0x2d5   :  { %v1924_v26 = vpop.permute.xlu1 %1923 }
 0x2d6   :  { %v2125_v39 = vadd.f32 %v4514_v29, %v1965_v33  ;;  %v2126_v21 = vadd.f32 %v4514_v29, %v1966_v30  ;;  %v1967_v11 = vmul.f32 %v1924_v26, %v1787_v34  ;;  %v1968_v43 = vmul.f32 %v1924_v26, %v1788_v27 }
 0x2d8   :  { %2165 = vst [vmem:[#allocation2 + $0x110] sm:$0xff] %v2125_v39  ;;  %2166 = vst.msk [vmem:[#allocation2 + $0x118] sm:$0xff] %vm1430_vm1, %v2126_v21 }
 0x2d9   :  { %v2084_v60 = vpop.permute.xlu1 %2083 }
 0x2da   :  { %v2127_v42 = vadd.f32 %v2084_v60, %v1967_v11  ;;  %v2128_v14 = vadd.f32 %v2084_v60, %v1968_v43 }
 0x2dc   :  { %2167 = vst [vmem:[#allocation2 + $0x120] sm:$0xff] %v2127_v42  ;;  %2168 = vst.msk [vmem:[#allocation2 + $0x128] sm:$0xff] %vm1430_vm1, %v2128_v14 }
 0x320   :  { %v1929_v63 = vpop.permute.xlu0 %1928 }
 0x321   :  { %v1969_v61 = vmul.f32 %v1929_v63, %v1789_v54  ;;  %v1970_v13 = vmul.f32 %v1929_v63, %v1790_v0 }
 0x324   :  { %v2089_v47 = vpop.permute.xlu0 %2088 }
 0x325   :  { %v2129_v50 = vadd.f32 %v2089_v47, %v1969_v61  ;;  %v2130_v45 = vadd.f32 %v2089_v47, %v1970_v13 }
 0x327   :  { %2169 = vst [vmem:[#allocation2 + $0x130] sm:$0xff] %v2129_v50  ;;  %2170 = vst.msk [vmem:[#allocation2 + $0x138] sm:$0xff] %vm1430_vm1, %v2130_v45 }
 0x328   :  { %2269 = shalt.err (!%p2266_p4)
}
 0x329   :  { %s2282_s12 = smov 256   ;;  %s2283_s13 = smov 16  }
 0x32a   :  { %2182 = dma.vmem_to_hbm [thread:$0]  %s2177_s10, 5120, %s4441_s5, [#allocation3], %s2282_s12, %s2282_s12, %s2283_s13  }
 0x32b   :  { %2278 = dma.done.wait [#allocation3], 5120  }
 0x32c   :  { %2279 = vsyncadd [#allocation3], 4294962176 }
 0x32d   :  { %2186 = vsyncpa [#allocation3], 1 }

</bundles_post_ra>
